<compile_context>
chip_gen: v7x
topology: tpu7x:2x2x1
jax: 0.10.0
libtpu: 0.0.40
codegen_flags: <defaults>
</compile_context>

<pallas_src>
import jax
import jax.numpy as jnp
from jax.experimental import pallas as pl
from jax.experimental.pallas import tpu as pltpu


def _make_conv_kernel(H, W, C_in, C_out, ksize, stride, pad, H_out, W_out):
    """Builds the per-image conv kernel.  All sizes are static Python ints."""
    Hp = H + 2 * pad
    Wp = W + 2 * pad                      # padded row length
    K = ksize * ksize * C_in              # im2col contraction size
    # Row pitch of the im2col slab / accumulator.  With stride 1 we keep the padded
    # pitch Wp so every slab row is ONE contiguous lane slice of the flat padded image
    # (the (k-1) extra columns per row are skipped at store time); with stride > 1 the
    # slab is gathered one output row at a time (gapless).
    Wrow = Wp if stride == 1 else W_out
    M = H_out * Wrow

    def kernel(x_ref, w_ref, b_ref, o_ref, xpf_ref, col_ref):
        # x_ref  : (1, C_in, H*W)            flat NCHW image block (lane axis = H*W)
        # w_ref  : (C_out, K)                K = k*k*C_in, tap-major columns (di, dj, ci)
        # b_ref  : (C_out, 1)
        # o_ref  : (1, C_out, H_out*W_out)   lane-dense output block
        # xpf_ref: (C_in, Hp*Wp + Wp)        VMEM scratch: flat reflect-padded image
        # col_ref: (K, M)                    VMEM scratch: im2col slab

        x = x_ref[0]                                    # (C_in, H*W)

        # ---- fused reflect padding, built directly in the flat padded layout --------
        # (PyTorch ReflectionPad2d semantics; requires pad < min(H, W), same as torch.)
        for h in range(H):
            r0 = (pad + h) * Wp                         # flat offset of padded row h
            xpf_ref[:, r0 + pad:r0 + pad + W] = x[:, h * W:(h + 1) * W]
            for c in range(pad):                        # horizontal halo of this row
                xpf_ref[:, r0 + pad - 1 - c:r0 + pad - c] = \
                    xpf_ref[:, r0 + pad + 1 + c:r0 + pad + 2 + c]
                xpf_ref[:, r0 + pad + W + c:r0 + pad + W + c + 1] = \
                    xpf_ref[:, r0 + pad + W - 2 - c:r0 + pad + W - 1 - c]
        for r in range(pad):                            # vertical halo rows: full padded
            src_t = (pad + 1 + r) * Wp                  # width -> corners come out right
            dst_t = (pad - 1 - r) * Wp
            xpf_ref[:, dst_t:dst_t + Wp] = xpf_ref[:, src_t:src_t + Wp]
            src_b = (pad + H - 2 - r) * Wp
            dst_b = (pad + H + r) * Wp
            xpf_ref[:, dst_b:dst_b + Wp] = xpf_ref[:, src_b:src_b + Wp]
        # Zero the small tail (only ever read into throw-away slab columns).
        xpf_ref[:, Hp * Wp:Hp * Wp + Wp] = jnp.zeros((C_in, Wp), xpf_ref.dtype)

        # ---- im2col slab: (K, M) with the spatial axis on lanes ----------------------
        for di in range(ksize):
            for dj in range(ksize):
                t0 = (di * ksize + dj) * C_in
                if stride == 1:
                    off = di * Wp + dj                  # one contiguous lane slice / tap
                    col_ref[t0:t0 + C_in, :] = xpf_ref[:, off:off + M]
                else:
                    for h in range(H_out):              # gapless, strided gather per row
                        src = pl.ds((h * stride + di) * Wp + dj, W_out, stride=stride)
                        col_ref[t0:t0 + C_in, h * W_out:(h + 1) * W_out] = xpf_ref[:, src]

        # ---- single MXU matmul + bias, f32 accumulation ------------------------------
        acc = jnp.dot(w_ref[...], col_ref[...], preferred_element_type=jnp.float32)
        acc = (acc + b_ref[...].astype(jnp.float32)).astype(o_ref.dtype)   # (C_out, M)

        # ---- lane-dense store; skip the (k-1) throw-away columns per row -------------
        if Wrow == W_out:
            o_ref[0] = acc
        else:
            for h in range(H_out):
                o_ref[0, :, h * W_out:(h + 1) * W_out] = acc[:, h * Wrow:h * Wrow + W_out]

    return kernel


def conv_no_tanh(x, weight, bias, *, stride=1):
    """x: (N, C_in, H, W); weight: (C_out, C_in, k, k); bias: (C_out,) -> NCHW output."""
    N, C_in, H, W = x.shape
    C_out, C_in_w, ksize, ksize2 = weight.shape
    assert C_in_w == C_in and ksize == ksize2
    pad = ksize // 2
    Hp, Wp = H + 2 * pad, W + 2 * pad
    H_out = (Hp - ksize) // stride + 1
    W_out = (Wp - ksize) // stride + 1
    K = ksize * ksize * C_in
    Wrow = Wp if stride == 1 else W_out
    M = H_out * Wrow

    # Wrapper does only free reshapes + tiny weight prep (no transposes of x or y).
    x_flat = x.reshape(N, C_in, H * W)
    # (C_out, C_in, k, k) -> (C_out, k, k, C_in) -> (C_out, K): columns ordered (di, dj, ci)
    # to match the im2col slab rows.
    w_mat = jnp.transpose(weight, (0, 2, 3, 1)).reshape(C_out, K)
    b_col = bias.reshape(C_out, 1)

    kernel = _make_conv_kernel(H, W, C_in, C_out, ksize, stride, pad, H_out, W_out)

    itemsize = x.dtype.itemsize
    flops = 2 * N * H_out * W_out * K * C_out
    bytes_accessed = (x.size + w_mat.size + b_col.size
                      + N * C_out * H_out * W_out) * itemsize

    out_flat = pl.pallas_call(
        kernel,
        out_shape=jax.ShapeDtypeStruct((N, C_out, H_out * W_out), x.dtype),
        grid=(N,),
        in_specs=[
            pl.BlockSpec((1, C_in, H * W), lambda n: (n, 0, 0)),
            pl.BlockSpec((C_out, K), lambda n: (0, 0)),
            pl.BlockSpec((C_out, 1), lambda n: (0, 0)),
        ],
        out_specs=pl.BlockSpec((1, C_out, H_out * W_out), lambda n: (n, 0, 0)),
        scratch_shapes=[
            pltpu.VMEM((C_in, Hp * Wp + Wp), x.dtype),   # flat reflect-padded image
            pltpu.VMEM((K, M), x.dtype),                 # im2col slab
        ],
        compiler_params=pltpu.CompilerParams(
            dimension_semantics=("parallel",),           # N >= 2 -> both v7x TensorCores
            vmem_limit_bytes=32 * 1024 * 1024,           # explicit; v7x physical is 64 MiB
        ),
        cost_estimate=pl.CostEstimate(flops=flops, transcendentals=0,
                                      bytes_accessed=bytes_accessed),
    )(x_flat, w_mat, b_col)

    # (N, C_out, H_out*W_out) -> (N, C_out, H_out, W_out): pure reshape, same HBM layout,
    # so the output is already NCHW (no transpose anywhere).
    return out_flat.reshape(N, C_out, H_out, W_out)


def _conv_reference(x, weight, bias, stride):
    """Pure-JAX reference: reflect pad + conv2d + bias (PyTorch semantics)."""
    k = weight.shape[2]
    p = k // 2
    xpad = jnp.pad(x, ((0, 0), (0, 0), (p, p), (p, p)), mode="reflect")
    y = jax.lax.conv_general_dilated(
        xpad, weight, window_strides=(stride, stride), padding="VALID",
        dimension_numbers=("NCHW", "OIHW", "NCHW"),
        precision=jax.lax.Precision.HIGHEST)
    return y + bias.reshape(1, -1, 1, 1)


if __name__ == "__main__":
    key = jax.random.PRNGKey(0)
    k1, k2, k3 = jax.random.split(key, 3)

    # ConvNoTanhLayer(in_channels=4, out_channels=8, kernel_size=3, stride=1)
    N, C_in, C_out, H, W = 2, 4, 8, 16, 16
    ksize, stride = 3, 1

    x = jax.random.normal(k1, (N, C_in, H, W), dtype=jnp.float32)
    weight = 0.1 * jax.random.normal(k2, (C_out, C_in, ksize, ksize), dtype=jnp.float32)
    bias = 0.1 * jax.random.normal(k3, (C_out,), dtype=jnp.float32)

    y = conv_no_tanh(x, weight, bias, stride=stride)
    y = jax.block_until_ready(y)

    y_ref = _conv_reference(x, weight, bias, stride)
    assert y.shape == y_ref.shape and y.dtype == x.dtype
    assert jnp.allclose(y, y_ref, atol=1e-3, rtol=1e-3)

    print("KERNEL_OK")
</pallas_src>

<mosaic_0001>
module attributes {stable_mosaic.version = 11 : i64} {
  func.func @kernel(%arg0: i32, %arg1: memref<1x4x256xf32, #tpu.memory_space<vmem>>, %arg2: memref<8x36xf32, #tpu.memory_space<vmem>>, %arg3: memref<8x1xf32, #tpu.memory_space<vmem>>, %arg4: memref<1x8x256xf32, #tpu.memory_space<vmem>>, %arg5: memref<4x342xf32, #tpu.memory_space<vmem>>, %arg6: memref<36x288xf32, #tpu.memory_space<vmem>>) attributes {dimension_semantics = [#tpu.dimension_semantics<parallel>], iteration_bounds = array<i64: 2>, scalar_prefetch = 0 : i64, scratch_operands = 2 : i64, tpu.core_type = #tpu.core_type<tc>, window_params = [{transform_indices = @transform_0, window_bounds = array<i64: 1, 4, 256>}, {pipeline_mode = #tpu.pipeline_mode<synchronous>, transform_indices = @transform_1, window_bounds = array<i64: 8, 36>}, {pipeline_mode = #tpu.pipeline_mode<synchronous>, transform_indices = @transform_2, window_bounds = array<i64: 8, 1>}, {transform_indices = @transform_3, window_bounds = array<i64: 1, 8, 256>}]} {
    %c0 = arith.constant 0 : index
    %c0_0 = arith.constant 0 : index
    %c0_1 = arith.constant 0 : index
    %0 = vector.load %arg1[%c0, %c0_0, %c0_1] : memref<1x4x256xf32, #tpu.memory_space<vmem>>, vector<1x4x256xf32>
    %1 = vector.shape_cast %0 : vector<1x4x256xf32> to vector<4x256xf32>
    %2 = vector.extract_strided_slice %1 {offsets = [0, 0], sizes = [4, 16], strides = [1, 1]} : vector<4x256xf32> to vector<4x16xf32>
    %c0_2 = arith.constant 0 : index
    %c19 = arith.constant 19 : index
    %3 = vector.load %arg5[%c0_2, %c19] : memref<4x342xf32, #tpu.memory_space<vmem>>, vector<4x16xf32>
    tpu.vector_store %arg5[%c0_2, %c19], %2 {strides = array<i32>} : memref<4x342xf32, #tpu.memory_space<vmem>>, vector<4x16xf32>,
    %c0_3 = arith.constant 0 : index
    %c20 = arith.constant 20 : index
    %4 = vector.load %arg5[%c0_3, %c20] : memref<4x342xf32, #tpu.memory_space<vmem>>, vector<4x1xf32>
    %c0_4 = arith.constant 0 : index
    %c18 = arith.constant 18 : index
    %5 = vector.load %arg5[%c0_4, %c18] : memref<4x342xf32, #tpu.memory_space<vmem>>, vector<4x1xf32>
    tpu.vector_store %arg5[%c0_4, %c18], %4 {strides = array<i32>} : memref<4x342xf32, #tpu.memory_space<vmem>>, vector<4x1xf32>,
    %c0_5 = arith.constant 0 : index
    %c33 = arith.constant 33 : index
    %6 = vector.load %arg5[%c0_5, %c33] : memref<4x342xf32, #tpu.memory_space<vmem>>, vector<4x1xf32>
    %c0_6 = arith.constant 0 : index
    %c35 = arith.constant 35 : index
    %7 = vector.load %arg5[%c0_6, %c35] : memref<4x342xf32, #tpu.memory_space<vmem>>, vector<4x1xf32>
    tpu.vector_store %arg5[%c0_6, %c35], %6 {strides = array<i32>} : memref<4x342xf32, #tpu.memory_space<vmem>>, vector<4x1xf32>,
    %8 = vector.extract_strided_slice %1 {offsets = [0, 16], sizes = [4, 16], strides = [1, 1]} : vector<4x256xf32> to vector<4x16xf32>
    %c0_7 = arith.constant 0 : index
    %c37 = arith.constant 37 : index
    %9 = vector.load %arg5[%c0_7, %c37] : memref<4x342xf32, #tpu.memory_space<vmem>>, vector<4x16xf32>
    tpu.vector_store %arg5[%c0_7, %c37], %8 {strides = array<i32>} : memref<4x342xf32, #tpu.memory_space<vmem>>, vector<4x16xf32>,
    %c0_8 = arith.constant 0 : index
    %c38 = arith.constant 38 : index
    %10 = vector.load %arg5[%c0_8, %c38] : memref<4x342xf32, #tpu.memory_space<vmem>>, vector<4x1xf32>
    %c0_9 = arith.constant 0 : index
    %c36 = arith.constant 36 : index
    %11 = vector.load %arg5[%c0_9, %c36] : memref<4x342xf32, #tpu.memory_space<vmem>>, vector<4x1xf32>
    tpu.vector_store %arg5[%c0_9, %c36], %10 {strides = array<i32>} : memref<4x342xf32, #tpu.memory_space<vmem>>, vector<4x1xf32>,
    %c0_10 = arith.constant 0 : index
    %c51 = arith.constant 51 : index
    %12 = vector.load %arg5[%c0_10, %c51] : memref<4x342xf32, #tpu.memory_space<vmem>>, vector<4x1xf32>
    %c0_11 = arith.constant 0 : index
    %c53 = arith.constant 53 : index
    %13 = vector.load %arg5[%c0_11, %c53] : memref<4x342xf32, #tpu.memory_space<vmem>>, vector<4x1xf32>
    tpu.vector_store %arg5[%c0_11, %c53], %12 {strides = array<i32>} : memref<4x342xf32, #tpu.memory_space<vmem>>, vector<4x1xf32>,
    %14 = vector.extract_strided_slice %1 {offsets = [0, 32], sizes = [4, 16], strides = [1, 1]} : vector<4x256xf32> to vector<4x16xf32>
    %c0_12 = arith.constant 0 : index
    %c55 = arith.constant 55 : index
    %15 = vector.load %arg5[%c0_12, %c55] : memref<4x342xf32, #tpu.memory_space<vmem>>, vector<4x16xf32>
    tpu.vector_store %arg5[%c0_12, %c55], %14 {strides = array<i32>} : memref<4x342xf32, #tpu.memory_space<vmem>>, vector<4x16xf32>,
    %c0_13 = arith.constant 0 : index
    %c56 = arith.constant 56 : index
    %16 = vector.load %arg5[%c0_13, %c56] : memref<4x342xf32, #tpu.memory_space<vmem>>, vector<4x1xf32>
    %c0_14 = arith.constant 0 : index
    %c54 = arith.constant 54 : index
    %17 = vector.load %arg5[%c0_14, %c54] : memref<4x342xf32, #tpu.memory_space<vmem>>, vector<4x1xf32>
    tpu.vector_store %arg5[%c0_14, %c54], %16 {strides = array<i32>} : memref<4x342xf32, #tpu.memory_space<vmem>>, vector<4x1xf32>,
    %c0_15 = arith.constant 0 : index
    %c69 = arith.constant 69 : index
    %18 = vector.load %arg5[%c0_15, %c69] : memref<4x342xf32, #tpu.memory_space<vmem>>, vector<4x1xf32>
    %c0_16 = arith.constant 0 : index
    %c71 = arith.constant 71 : index
    %19 = vector.load %arg5[%c0_16, %c71] : memref<4x342xf32, #tpu.memory_space<vmem>>, vector<4x1xf32>
    tpu.vector_store %arg5[%c0_16, %c71], %18 {strides = array<i32>} : memref<4x342xf32, #tpu.memory_space<vmem>>, vector<4x1xf32>,
    %20 = vector.extract_strided_slice %1 {offsets = [0, 48], sizes = [4, 16], strides = [1, 1]} : vector<4x256xf32> to vector<4x16xf32>
    %c0_17 = arith.constant 0 : index
    %c73 = arith.constant 73 : index
    %21 = vector.load %arg5[%c0_17, %c73] : memref<4x342xf32, #tpu.memory_space<vmem>>, vector<4x16xf32>
    tpu.vector_store %arg5[%c0_17, %c73], %20 {strides = array<i32>} : memref<4x342xf32, #tpu.memory_space<vmem>>, vector<4x16xf32>,
    %c0_18 = arith.constant 0 : index
    %c74 = arith.constant 74 : index
    %22 = vector.load %arg5[%c0_18, %c74] : memref<4x342xf32, #tpu.memory_space<vmem>>, vector<4x1xf32>
    %c0_19 = arith.constant 0 : index
    %c72 = arith.constant 72 : index
    %23 = vector.load %arg5[%c0_19, %c72] : memref<4x342xf32, #tpu.memory_space<vmem>>, vector<4x1xf32>
    tpu.vector_store %arg5[%c0_19, %c72], %22 {strides = array<i32>} : memref<4x342xf32, #tpu.memory_space<vmem>>, vector<4x1xf32>,
    %c0_20 = arith.constant 0 : index
    %c87 = arith.constant 87 : index
    %24 = vector.load %arg5[%c0_20, %c87] : memref<4x342xf32, #tpu.memory_space<vmem>>, vector<4x1xf32>
    %c0_21 = arith.constant 0 : index
    %c89 = arith.constant 89 : index
    %25 = vector.load %arg5[%c0_21, %c89] : memref<4x342xf32, #tpu.memory_space<vmem>>, vector<4x1xf32>
    tpu.vector_store %arg5[%c0_21, %c89], %24 {strides = array<i32>} : memref<4x342xf32, #tpu.memory_space<vmem>>, vector<4x1xf32>,
    %26 = vector.extract_strided_slice %1 {offsets = [0, 64], sizes = [4, 16], strides = [1, 1]} : vector<4x256xf32> to vector<4x16xf32>
    %c0_22 = arith.constant 0 : index
    %c91 = arith.constant 91 : index
    %27 = vector.load %arg5[%c0_22, %c91] : memref<4x342xf32, #tpu.memory_space<vmem>>, vector<4x16xf32>
    tpu.vector_store %arg5[%c0_22, %c91], %26 {strides = array<i32>} : memref<4x342xf32, #tpu.memory_space<vmem>>, vector<4x16xf32>,
    %c0_23 = arith.constant 0 : index
    %c92 = arith.constant 92 : index
    %28 = vector.load %arg5[%c0_23, %c92] : memref<4x342xf32, #tpu.memory_space<vmem>>, vector<4x1xf32>
    %c0_24 = arith.constant 0 : index
    %c90 = arith.constant 90 : index
    %29 = vector.load %arg5[%c0_24, %c90] : memref<4x342xf32, #tpu.memory_space<vmem>>, vector<4x1xf32>
    tpu.vector_store %arg5[%c0_24, %c90], %28 {strides = array<i32>} : memref<4x342xf32, #tpu.memory_space<vmem>>, vector<4x1xf32>,
    %c0_25 = arith.constant 0 : index
    %c105 = arith.constant 105 : index
    %30 = vector.load %arg5[%c0_25, %c105] : memref<4x342xf32, #tpu.memory_space<vmem>>, vector<4x1xf32>
    %c0_26 = arith.constant 0 : index
    %c107 = arith.constant 107 : index
    %31 = vector.load %arg5[%c0_26, %c107] : memref<4x342xf32, #tpu.memory_space<vmem>>, vector<4x1xf32>
    tpu.vector_store %arg5[%c0_26, %c107], %30 {strides = array<i32>} : memref<4x342xf32, #tpu.memory_space<vmem>>, vector<4x1xf32>,
    %32 = vector.extract_strided_slice %1 {offsets = [0, 80], sizes = [4, 16], strides = [1, 1]} : vector<4x256xf32> to vector<4x16xf32>
    %c0_27 = arith.constant 0 : index
    %c109 = arith.constant 109 : index
    %33 = vector.load %arg5[%c0_27, %c109] : memref<4x342xf32, #tpu.memory_space<vmem>>, vector<4x16xf32>
    tpu.vector_store %arg5[%c0_27, %c109], %32 {strides = array<i32>} : memref<4x342xf32, #tpu.memory_space<vmem>>, vector<4x16xf32>,
    %c0_28 = arith.constant 0 : index
    %c110 = arith.constant 110 : index
    %34 = vector.load %arg5[%c0_28, %c110] : memref<4x342xf32, #tpu.memory_space<vmem>>, vector<4x1xf32>
    %c0_29 = arith.constant 0 : index
    %c108 = arith.constant 108 : index
    %35 = vector.load %arg5[%c0_29, %c108] : memref<4x342xf32, #tpu.memory_space<vmem>>, vector<4x1xf32>
    tpu.vector_store %arg5[%c0_29, %c108], %34 {strides = array<i32>} : memref<4x342xf32, #tpu.memory_space<vmem>>, vector<4x1xf32>,
    %c0_30 = arith.constant 0 : index
    %c123 = arith.constant 123 : index
    %36 = vector.load %arg5[%c0_30, %c123] : memref<4x342xf32, #tpu.memory_space<vmem>>, vector<4x1xf32>
    %c0_31 = arith.constant 0 : index
    %c125 = arith.constant 125 : index
    %37 = vector.load %arg5[%c0_31, %c125] : memref<4x342xf32, #tpu.memory_space<vmem>>, vector<4x1xf32>
    tpu.vector_store %arg5[%c0_31, %c125], %36 {strides = array<i32>} : memref<4x342xf32, #tpu.memory_space<vmem>>, vector<4x1xf32>,
    %38 = vector.extract_strided_slice %1 {offsets = [0, 96], sizes = [4, 16], strides = [1, 1]} : vector<4x256xf32> to vector<4x16xf32>
    %c0_32 = arith.constant 0 : index
    %c127 = arith.constant 127 : index
    %39 = vector.load %arg5[%c0_32, %c127] : memref<4x342xf32, #tpu.memory_space<vmem>>, vector<4x16xf32>
    tpu.vector_store %arg5[%c0_32, %c127], %38 {strides = array<i32>} : memref<4x342xf32, #tpu.memory_space<vmem>>, vector<4x16xf32>,
    %c0_33 = arith.constant 0 : index
    %c128 = arith.constant 128 : index
    %40 = vector.load %arg5[%c0_33, %c128] : memref<4x342xf32, #tpu.memory_space<vmem>>, vector<4x1xf32>
    %c0_34 = arith.constant 0 : index
    %c126 = arith.constant 126 : index
    %41 = vector.load %arg5[%c0_34, %c126] : memref<4x342xf32, #tpu.memory_space<vmem>>, vector<4x1xf32>
    tpu.vector_store %arg5[%c0_34, %c126], %40 {strides = array<i32>} : memref<4x342xf32, #tpu.memory_space<vmem>>, vector<4x1xf32>,
    %c0_35 = arith.constant 0 : index
    %c141 = arith.constant 141 : index
    %42 = vector.load %arg5[%c0_35, %c141] : memref<4x342xf32, #tpu.memory_space<vmem>>, vector<4x1xf32>
    %c0_36 = arith.constant 0 : index
    %c143 = arith.constant 143 : index
    %43 = vector.load %arg5[%c0_36, %c143] : memref<4x342xf32, #tpu.memory_space<vmem>>, vector<4x1xf32>
    tpu.vector_store %arg5[%c0_36, %c143], %42 {strides = array<i32>} : memref<4x342xf32, #tpu.memory_space<vmem>>, vector<4x1xf32>,
    %44 = vector.extract_strided_slice %1 {offsets = [0, 112], sizes = [4, 16], strides = [1, 1]} : vector<4x256xf32> to vector<4x16xf32>
    %c0_37 = arith.constant 0 : index
    %c145 = arith.constant 145 : index
    %45 = vector.load %arg5[%c0_37, %c145] : memref<4x342xf32, #tpu.memory_space<vmem>>, vector<4x16xf32>
    tpu.vector_store %arg5[%c0_37, %c145], %44 {strides = array<i32>} : memref<4x342xf32, #tpu.memory_space<vmem>>, vector<4x16xf32>,
    %c0_38 = arith.constant 0 : index
    %c146 = arith.constant 146 : index
    %46 = vector.load %arg5[%c0_38, %c146] : memref<4x342xf32, #tpu.memory_space<vmem>>, vector<4x1xf32>
    %c0_39 = arith.constant 0 : index
    %c144 = arith.constant 144 : index
    %47 = vector.load %arg5[%c0_39, %c144] : memref<4x342xf32, #tpu.memory_space<vmem>>, vector<4x1xf32>
    tpu.vector_store %arg5[%c0_39, %c144], %46 {strides = array<i32>} : memref<4x342xf32, #tpu.memory_space<vmem>>, vector<4x1xf32>,
    %c0_40 = arith.constant 0 : index
    %c159 = arith.constant 159 : index
    %48 = vector.load %arg5[%c0_40, %c159] : memref<4x342xf32, #tpu.memory_space<vmem>>, vector<4x1xf32>
    %c0_41 = arith.constant 0 : index
    %c161 = arith.constant 161 : index
    %49 = vector.load %arg5[%c0_41, %c161] : memref<4x342xf32, #tpu.memory_space<vmem>>, vector<4x1xf32>
    tpu.vector_store %arg5[%c0_41, %c161], %48 {strides = array<i32>} : memref<4x342xf32, #tpu.memory_space<vmem>>, vector<4x1xf32>,
    %50 = vector.extract_strided_slice %1 {offsets = [0, 128], sizes = [4, 16], strides = [1, 1]} : vector<4x256xf32> to vector<4x16xf32>
    %c0_42 = arith.constant 0 : index
    %c163 = arith.constant 163 : index
    %51 = vector.load %arg5[%c0_42, %c163] : memref<4x342xf32, #tpu.memory_space<vmem>>, vector<4x16xf32>
    tpu.vector_store %arg5[%c0_42, %c163], %50 {strides = array<i32>} : memref<4x342xf32, #tpu.memory_space<vmem>>, vector<4x16xf32>,
    %c0_43 = arith.constant 0 : index
    %c164 = arith.constant 164 : index
    %52 = vector.load %arg5[%c0_43, %c164] : memref<4x342xf32, #tpu.memory_space<vmem>>, vector<4x1xf32>
    %c0_44 = arith.constant 0 : index
    %c162 = arith.constant 162 : index
    %53 = vector.load %arg5[%c0_44, %c162] : memref<4x342xf32, #tpu.memory_space<vmem>>, vector<4x1xf32>
    tpu.vector_store %arg5[%c0_44, %c162], %52 {strides = array<i32>} : memref<4x342xf32, #tpu.memory_space<vmem>>, vector<4x1xf32>,
    %c0_45 = arith.constant 0 : index
    %c177 = arith.constant 177 : index
    %54 = vector.load %arg5[%c0_45, %c177] : memref<4x342xf32, #tpu.memory_space<vmem>>, vector<4x1xf32>
    %c0_46 = arith.constant 0 : index
    %c179 = arith.constant 179 : index
    %55 = vector.load %arg5[%c0_46, %c179] : memref<4x342xf32, #tpu.memory_space<vmem>>, vector<4x1xf32>
    tpu.vector_store %arg5[%c0_46, %c179], %54 {strides = array<i32>} : memref<4x342xf32, #tpu.memory_space<vmem>>, vector<4x1xf32>,
    %56 = vector.extract_strided_slice %1 {offsets = [0, 144], sizes = [4, 16], strides = [1, 1]} : vector<4x256xf32> to vector<4x16xf32>
    %c0_47 = arith.constant 0 : index
    %c181 = arith.constant 181 : index
    %57 = vector.load %arg5[%c0_47, %c181] : memref<4x342xf32, #tpu.memory_space<vmem>>, vector<4x16xf32>
    tpu.vector_store %arg5[%c0_47, %c181], %56 {strides = array<i32>} : memref<4x342xf32, #tpu.memory_space<vmem>>, vector<4x16xf32>,
    %c0_48 = arith.constant 0 : index
    %c182 = arith.constant 182 : index
    %58 = vector.load %arg5[%c0_48, %c182] : memref<4x342xf32, #tpu.memory_space<vmem>>, vector<4x1xf32>
    %c0_49 = arith.constant 0 : index
    %c180 = arith.constant 180 : index
    %59 = vector.load %arg5[%c0_49, %c180] : memref<4x342xf32, #tpu.memory_space<vmem>>, vector<4x1xf32>
    tpu.vector_store %arg5[%c0_49, %c180], %58 {strides = array<i32>} : memref<4x342xf32, #tpu.memory_space<vmem>>, vector<4x1xf32>,
    %c0_50 = arith.constant 0 : index
    %c195 = arith.constant 195 : index
    %60 = vector.load %arg5[%c0_50, %c195] : memref<4x342xf32, #tpu.memory_space<vmem>>, vector<4x1xf32>
    %c0_51 = arith.constant 0 : index
    %c197 = arith.constant 197 : index
    %61 = vector.load %arg5[%c0_51, %c197] : memref<4x342xf32, #tpu.memory_space<vmem>>, vector<4x1xf32>
    tpu.vector_store %arg5[%c0_51, %c197], %60 {strides = array<i32>} : memref<4x342xf32, #tpu.memory_space<vmem>>, vector<4x1xf32>,
    %62 = vector.extract_strided_slice %1 {offsets = [0, 160], sizes = [4, 16], strides = [1, 1]} : vector<4x256xf32> to vector<4x16xf32>
    %c0_52 = arith.constant 0 : index
    %c199 = arith.constant 199 : index
    %63 = vector.load %arg5[%c0_52, %c199] : memref<4x342xf32, #tpu.memory_space<vmem>>, vector<4x16xf32>
    tpu.vector_store %arg5[%c0_52, %c199], %62 {strides = array<i32>} : memref<4x342xf32, #tpu.memory_space<vmem>>, vector<4x16xf32>,
    %c0_53 = arith.constant 0 : index
    %c200 = arith.constant 200 : index
    %64 = vector.load %arg5[%c0_53, %c200] : memref<4x342xf32, #tpu.memory_space<vmem>>, vector<4x1xf32>
    %c0_54 = arith.constant 0 : index
    %c198 = arith.constant 198 : index
    %65 = vector.load %arg5[%c0_54, %c198] : memref<4x342xf32, #tpu.memory_space<vmem>>, vector<4x1xf32>
    tpu.vector_store %arg5[%c0_54, %c198], %64 {strides = array<i32>} : memref<4x342xf32, #tpu.memory_space<vmem>>, vector<4x1xf32>,
    %c0_55 = arith.constant 0 : index
    %c213 = arith.constant 213 : index
    %66 = vector.load %arg5[%c0_55, %c213] : memref<4x342xf32, #tpu.memory_space<vmem>>, vector<4x1xf32>
    %c0_56 = arith.constant 0 : index
    %c215 = arith.constant 215 : index
    %67 = vector.load %arg5[%c0_56, %c215] : memref<4x342xf32, #tpu.memory_space<vmem>>, vector<4x1xf32>
    tpu.vector_store %arg5[%c0_56, %c215], %66 {strides = array<i32>} : memref<4x342xf32, #tpu.memory_space<vmem>>, vector<4x1xf32>,
    %68 = vector.extract_strided_slice %1 {offsets = [0, 176], sizes = [4, 16], strides = [1, 1]} : vector<4x256xf32> to vector<4x16xf32>
    %c0_57 = arith.constant 0 : index
    %c217 = arith.constant 217 : index
    %69 = vector.load %arg5[%c0_57, %c217] : memref<4x342xf32, #tpu.memory_space<vmem>>, vector<4x16xf32>
    tpu.vector_store %arg5[%c0_57, %c217], %68 {strides = array<i32>} : memref<4x342xf32, #tpu.memory_space<vmem>>, vector<4x16xf32>,
    %c0_58 = arith.constant 0 : index
    %c218 = arith.constant 218 : index
    %70 = vector.load %arg5[%c0_58, %c218] : memref<4x342xf32, #tpu.memory_space<vmem>>, vector<4x1xf32>
    %c0_59 = arith.constant 0 : index
    %c216 = arith.constant 216 : index
    %71 = vector.load %arg5[%c0_59, %c216] : memref<4x342xf32, #tpu.memory_space<vmem>>, vector<4x1xf32>
    tpu.vector_store %arg5[%c0_59, %c216], %70 {strides = array<i32>} : memref<4x342xf32, #tpu.memory_space<vmem>>, vector<4x1xf32>,
    %c0_60 = arith.constant 0 : index
    %c231 = arith.constant 231 : index
    %72 = vector.load %arg5[%c0_60, %c231] : memref<4x342xf32, #tpu.memory_space<vmem>>, vector<4x1xf32>
    %c0_61 = arith.constant 0 : index
    %c233 = arith.constant 233 : index
    %73 = vector.load %arg5[%c0_61, %c233] : memref<4x342xf32, #tpu.memory_space<vmem>>, vector<4x1xf32>
    tpu.vector_store %arg5[%c0_61, %c233], %72 {strides = array<i32>} : memref<4x342xf32, #tpu.memory_space<vmem>>, vector<4x1xf32>,
    %74 = vector.extract_strided_slice %1 {offsets = [0, 192], sizes = [4, 16], strides = [1, 1]} : vector<4x256xf32> to vector<4x16xf32>
    %c0_62 = arith.constant 0 : index
    %c235 = arith.constant 235 : index
    %75 = vector.load %arg5[%c0_62, %c235] : memref<4x342xf32, #tpu.memory_space<vmem>>, vector<4x16xf32>
    tpu.vector_store %arg5[%c0_62, %c235], %74 {strides = array<i32>} : memref<4x342xf32, #tpu.memory_space<vmem>>, vector<4x16xf32>,
    %c0_63 = arith.constant 0 : index
    %c236 = arith.constant 236 : index
    %76 = vector.load %arg5[%c0_63, %c236] : memref<4x342xf32, #tpu.memory_space<vmem>>, vector<4x1xf32>
    %c0_64 = arith.constant 0 : index
    %c234 = arith.constant 234 : index
    %77 = vector.load %arg5[%c0_64, %c234] : memref<4x342xf32, #tpu.memory_space<vmem>>, vector<4x1xf32>
    tpu.vector_store %arg5[%c0_64, %c234], %76 {strides = array<i32>} : memref<4x342xf32, #tpu.memory_space<vmem>>, vector<4x1xf32>,
    %c0_65 = arith.constant 0 : index
    %c249 = arith.constant 249 : index
    %78 = vector.load %arg5[%c0_65, %c249] : memref<4x342xf32, #tpu.memory_space<vmem>>, vector<4x1xf32>
    %c0_66 = arith.constant 0 : index
    %c251 = arith.constant 251 : index
    %79 = vector.load %arg5[%c0_66, %c251] : memref<4x342xf32, #tpu.memory_space<vmem>>, vector<4x1xf32>
    tpu.vector_store %arg5[%c0_66, %c251], %78 {strides = array<i32>} : memref<4x342xf32, #tpu.memory_space<vmem>>, vector<4x1xf32>,
    %80 = vector.extract_strided_slice %1 {offsets = [0, 208], sizes = [4, 16], strides = [1, 1]} : vector<4x256xf32> to vector<4x16xf32>
    %c0_67 = arith.constant 0 : index
    %c253 = arith.constant 253 : index
    %81 = vector.load %arg5[%c0_67, %c253] : memref<4x342xf32, #tpu.memory_space<vmem>>, vector<4x16xf32>
    tpu.vector_store %arg5[%c0_67, %c253], %80 {strides = array<i32>} : memref<4x342xf32, #tpu.memory_space<vmem>>, vector<4x16xf32>,
    %c0_68 = arith.constant 0 : index
    %c254 = arith.constant 254 : index
    %82 = vector.load %arg5[%c0_68, %c254] : memref<4x342xf32, #tpu.memory_space<vmem>>, vector<4x1xf32>
    %c0_69 = arith.constant 0 : index
    %c252 = arith.constant 252 : index
    %83 = vector.load %arg5[%c0_69, %c252] : memref<4x342xf32, #tpu.memory_space<vmem>>, vector<4x1xf32>
    tpu.vector_store %arg5[%c0_69, %c252], %82 {strides = array<i32>} : memref<4x342xf32, #tpu.memory_space<vmem>>, vector<4x1xf32>,
    %c0_70 = arith.constant 0 : index
    %c267 = arith.constant 267 : index
    %84 = vector.load %arg5[%c0_70, %c267] : memref<4x342xf32, #tpu.memory_space<vmem>>, vector<4x1xf32>
    %c0_71 = arith.constant 0 : index
    %c269 = arith.constant 269 : index
    %85 = vector.load %arg5[%c0_71, %c269] : memref<4x342xf32, #tpu.memory_space<vmem>>, vector<4x1xf32>
    tpu.vector_store %arg5[%c0_71, %c269], %84 {strides = array<i32>} : memref<4x342xf32, #tpu.memory_space<vmem>>, vector<4x1xf32>,
    %86 = vector.extract_strided_slice %1 {offsets = [0, 224], sizes = [4, 16], strides = [1, 1]} : vector<4x256xf32> to vector<4x16xf32>
    %c0_72 = arith.constant 0 : index
    %c271 = arith.constant 271 : index
    %87 = vector.load %arg5[%c0_72, %c271] : memref<4x342xf32, #tpu.memory_space<vmem>>, vector<4x16xf32>
    tpu.vector_store %arg5[%c0_72, %c271], %86 {strides = array<i32>} : memref<4x342xf32, #tpu.memory_space<vmem>>, vector<4x16xf32>,
    %c0_73 = arith.constant 0 : index
    %c272 = arith.constant 272 : index
    %88 = vector.load %arg5[%c0_73, %c272] : memref<4x342xf32, #tpu.memory_space<vmem>>, vector<4x1xf32>
    %c0_74 = arith.constant 0 : index
    %c270 = arith.constant 270 : index
    %89 = vector.load %arg5[%c0_74, %c270] : memref<4x342xf32, #tpu.memory_space<vmem>>, vector<4x1xf32>
    tpu.vector_store %arg5[%c0_74, %c270], %88 {strides = array<i32>} : memref<4x342xf32, #tpu.memory_space<vmem>>, vector<4x1xf32>,
    %c0_75 = arith.constant 0 : index
    %c285 = arith.constant 285 : index
    %90 = vector.load %arg5[%c0_75, %c285] : memref<4x342xf32, #tpu.memory_space<vmem>>, vector<4x1xf32>
    %c0_76 = arith.constant 0 : index
    %c287 = arith.constant 287 : index
    %91 = vector.load %arg5[%c0_76, %c287] : memref<4x342xf32, #tpu.memory_space<vmem>>, vector<4x1xf32>
    tpu.vector_store %arg5[%c0_76, %c287], %90 {strides = array<i32>} : memref<4x342xf32, #tpu.memory_space<vmem>>, vector<4x1xf32>,
    %92 = vector.extract_strided_slice %1 {offsets = [0, 240], sizes = [4, 16], strides = [1, 1]} : vector<4x256xf32> to vector<4x16xf32>
    %c0_77 = arith.constant 0 : index
    %c289 = arith.constant 289 : index
    %93 = vector.load %arg5[%c0_77, %c289] : memref<4x342xf32, #tpu.memory_space<vmem>>, vector<4x16xf32>
    tpu.vector_store %arg5[%c0_77, %c289], %92 {strides = array<i32>} : memref<4x342xf32, #tpu.memory_space<vmem>>, vector<4x16xf32>,
    %c0_78 = arith.constant 0 : index
    %c290 = arith.constant 290 : index
    %94 = vector.load %arg5[%c0_78, %c290] : memref<4x342xf32, #tpu.memory_space<vmem>>, vector<4x1xf32>
    %c0_79 = arith.constant 0 : index
    %c288 = arith.constant 288 : index
    %95 = vector.load %arg5[%c0_79, %c288] : memref<4x342xf32, #tpu.memory_space<vmem>>, vector<4x1xf32>
    tpu.vector_store %arg5[%c0_79, %c288], %94 {strides = array<i32>} : memref<4x342xf32, #tpu.memory_space<vmem>>, vector<4x1xf32>,
    %c0_80 = arith.constant 0 : index
    %c303 = arith.constant 303 : index
    %96 = vector.load %arg5[%c0_80, %c303] : memref<4x342xf32, #tpu.memory_space<vmem>>, vector<4x1xf32>
    %c0_81 = arith.constant 0 : index
    %c305 = arith.constant 305 : index
    %97 = vector.load %arg5[%c0_81, %c305] : memref<4x342xf32, #tpu.memory_space<vmem>>, vector<4x1xf32>
    tpu.vector_store %arg5[%c0_81, %c305], %96 {strides = array<i32>} : memref<4x342xf32, #tpu.memory_space<vmem>>, vector<4x1xf32>,
    %c0_82 = arith.constant 0 : index
    %c36_83 = arith.constant 36 : index
    %98 = vector.load %arg5[%c0_82, %c36_83] : memref<4x342xf32, #tpu.memory_space<vmem>>, vector<4x18xf32>
    %c0_84 = arith.constant 0 : index
    %c0_85 = arith.constant 0 : index
    %99 = vector.load %arg5[%c0_84, %c0_85] : memref<4x342xf32, #tpu.memory_space<vmem>>, vector<4x18xf32>
    tpu.vector_store %arg5[%c0_84, %c0_85], %98 {strides = array<i32>} : memref<4x342xf32, #tpu.memory_space<vmem>>, vector<4x18xf32>,
    %c0_86 = arith.constant 0 : index
    %c270_87 = arith.constant 270 : index
    %100 = vector.load %arg5[%c0_86, %c270_87] : memref<4x342xf32, #tpu.memory_space<vmem>>, vector<4x18xf32>
    %c0_88 = arith.constant 0 : index
    %c306 = arith.constant 306 : index
    %101 = vector.load %arg5[%c0_88, %c306] : memref<4x342xf32, #tpu.memory_space<vmem>>, vector<4x18xf32>
    tpu.vector_store %arg5[%c0_88, %c306], %100 {strides = array<i32>} : memref<4x342xf32, #tpu.memory_space<vmem>>, vector<4x18xf32>,
    %cst = arith.constant 0.000000e+00 : f32
    %102 = vector.broadcast %cst : f32 to vector<4x18xf32>
    %c0_89 = arith.constant 0 : index
    %c324 = arith.constant 324 : index
    %103 = vector.load %arg5[%c0_89, %c324] : memref<4x342xf32, #tpu.memory_space<vmem>>, vector<4x18xf32>
    tpu.vector_store %arg5[%c0_89, %c324], %102 {strides = array<i32>} : memref<4x342xf32, #tpu.memory_space<vmem>>, vector<4x18xf32>,
    %c0_90 = arith.constant 0 : index
    %c0_91 = arith.constant 0 : index
    %104 = vector.load %arg5[%c0_90, %c0_91] : memref<4x342xf32, #tpu.memory_space<vmem>>, vector<4x288xf32>
    %c0_92 = arith.constant 0 : index
    %c0_93 = arith.constant 0 : index
    %105 = vector.load %arg6[%c0_92, %c0_93] : memref<36x288xf32, #tpu.memory_space<vmem>>, vector<4x288xf32>
    tpu.vector_store %arg6[%c0_92, %c0_93], %104 {strides = array<i32>} : memref<36x288xf32, #tpu.memory_space<vmem>>, vector<4x288xf32>,
    %c0_94 = arith.constant 0 : index
    %c1 = arith.constant 1 : index
    %106 = vector.load %arg5[%c0_94, %c1] : memref<4x342xf32, #tpu.memory_space<vmem>>, vector<4x288xf32>
    %c4 = arith.constant 4 : index
    %c0_95 = arith.constant 0 : index
    %107 = vector.load %arg6[%c4, %c0_95] : memref<36x288xf32, #tpu.memory_space<vmem>>, vector<4x288xf32>
    tpu.vector_store %arg6[%c4, %c0_95], %106 {strides = array<i32>} : memref<36x288xf32, #tpu.memory_space<vmem>>, vector<4x288xf32>,
    %c0_96 = arith.constant 0 : index
    %c2 = arith.constant 2 : index
    %108 = vector.load %arg5[%c0_96, %c2] : memref<4x342xf32, #tpu.memory_space<vmem>>, vector<4x288xf32>
    %c8 = arith.constant 8 : index
    %c0_97 = arith.constant 0 : index
    %109 = vector.load %arg6[%c8, %c0_97] : memref<36x288xf32, #tpu.memory_space<vmem>>, vector<4x288xf32>
    tpu.vector_store %arg6[%c8, %c0_97], %108 {strides = array<i32>} : memref<36x288xf32, #tpu.memory_space<vmem>>, vector<4x288xf32>,
    %c0_98 = arith.constant 0 : index
    %c18_99 = arith.constant 18 : index
    %110 = vector.load %arg5[%c0_98, %c18_99] : memref<4x342xf32, #tpu.memory_space<vmem>>, vector<4x288xf32>
    %c12 = arith.constant 12 : index
    %c0_100 = arith.constant 0 : index
    %111 = vector.load %arg6[%c12, %c0_100] : memref<36x288xf32, #tpu.memory_space<vmem>>, vector<4x288xf32>
    tpu.vector_store %arg6[%c12, %c0_100], %110 {strides = array<i32>} : memref<36x288xf32, #tpu.memory_space<vmem>>, vector<4x288xf32>,
    %c0_101 = arith.constant 0 : index
    %c19_102 = arith.constant 19 : index
    %112 = vector.load %arg5[%c0_101, %c19_102] : memref<4x342xf32, #tpu.memory_space<vmem>>, vector<4x288xf32>
    %c16 = arith.constant 16 : index
    %c0_103 = arith.constant 0 : index
    %113 = vector.load %arg6[%c16, %c0_103] : memref<36x288xf32, #tpu.memory_space<vmem>>, vector<4x288xf32>
    tpu.vector_store %arg6[%c16, %c0_103], %112 {strides = array<i32>} : memref<36x288xf32, #tpu.memory_space<vmem>>, vector<4x288xf32>,
    %c0_104 = arith.constant 0 : index
    %c20_105 = arith.constant 20 : index
    %114 = vector.load %arg5[%c0_104, %c20_105] : memref<4x342xf32, #tpu.memory_space<vmem>>, vector<4x288xf32>
    %c20_106 = arith.constant 20 : index
    %c0_107 = arith.constant 0 : index
    %115 = vector.load %arg6[%c20_106, %c0_107] : memref<36x288xf32, #tpu.memory_space<vmem>>, vector<4x288xf32>
    tpu.vector_store %arg6[%c20_106, %c0_107], %114 {strides = array<i32>} : memref<36x288xf32, #tpu.memory_space<vmem>>, vector<4x288xf32>,
    %c0_108 = arith.constant 0 : index
    %c36_109 = arith.constant 36 : index
    %116 = vector.load %arg5[%c0_108, %c36_109] : memref<4x342xf32, #tpu.memory_space<vmem>>, vector<4x288xf32>
    %c24 = arith.constant 24 : index
    %c0_110 = arith.constant 0 : index
    %117 = vector.load %arg6[%c24, %c0_110] : memref<36x288xf32, #tpu.memory_space<vmem>>, vector<4x288xf32>
    tpu.vector_store %arg6[%c24, %c0_110], %116 {strides = array<i32>} : memref<36x288xf32, #tpu.memory_space<vmem>>, vector<4x288xf32>,
    %c0_111 = arith.constant 0 : index
    %c37_112 = arith.constant 37 : index
    %118 = vector.load %arg5[%c0_111, %c37_112] : memref<4x342xf32, #tpu.memory_space<vmem>>, vector<4x288xf32>
    %c28 = arith.constant 28 : index
    %c0_113 = arith.constant 0 : index
    %119 = vector.load %arg6[%c28, %c0_113] : memref<36x288xf32, #tpu.memory_space<vmem>>, vector<4x288xf32>
    tpu.vector_store %arg6[%c28, %c0_113], %118 {strides = array<i32>} : memref<36x288xf32, #tpu.memory_space<vmem>>, vector<4x288xf32>,
    %c0_114 = arith.constant 0 : index
    %c38_115 = arith.constant 38 : index
    %120 = vector.load %arg5[%c0_114, %c38_115] : memref<4x342xf32, #tpu.memory_space<vmem>>, vector<4x288xf32>
    %c32 = arith.constant 32 : index
    %c0_116 = arith.constant 0 : index
    %121 = vector.load %arg6[%c32, %c0_116] : memref<36x288xf32, #tpu.memory_space<vmem>>, vector<4x288xf32>
    tpu.vector_store %arg6[%c32, %c0_116], %120 {strides = array<i32>} : memref<36x288xf32, #tpu.memory_space<vmem>>, vector<4x288xf32>,
    %c0_117 = arith.constant 0 : index
    %c0_118 = arith.constant 0 : index
    %122 = vector.load %arg2[%c0_117, %c0_118] : memref<8x36xf32, #tpu.memory_space<vmem>>, vector<8x36xf32>
    %c0_119 = arith.constant 0 : index
    %c0_120 = arith.constant 0 : index
    %123 = vector.load %arg6[%c0_119, %c0_120] : memref<36x288xf32, #tpu.memory_space<vmem>>, vector<36x288xf32>
    %cst_121 = arith.constant dense<0.000000e+00> : vector<8x288xf32>
    %124 = tpu.matmul %122, %123, %cst_121 {dimension_numbers = #tpu.dot_dimension_numbers<[1], [0], [0], [1], [0, 0, 1, 1], [], []>} : vector<8x36xf32>, vector<36x288xf32>, vector<8x288xf32> -> vector<8x288xf32>
    %c0_122 = arith.constant 0 : index
    %c0_123 = arith.constant 0 : index
    %125 = vector.load %arg3[%c0_122, %c0_123] : memref<8x1xf32, #tpu.memory_space<vmem>>, vector<8x1xf32>
    %126 = vector.broadcast %125 : vector<8x1xf32> to vector<8x288xf32>
    %127 = arith.addf %124, %126 : vector<8x288xf32>
    %128 = vector.extract_strided_slice %127 {offsets = [0, 0], sizes = [8, 16], strides = [1, 1]} : vector<8x288xf32> to vector<8x16xf32>
    %c0_124 = arith.constant 0 : index
    %c0_125 = arith.constant 0 : index
    %c0_126 = arith.constant 0 : index
    %129 = vector.load %arg4[%c0_124, %c0_125, %c0_126] : memref<1x8x256xf32, #tpu.memory_space<vmem>>, vector<1x8x16xf32>
    %130 = vector.shape_cast %129 : vector<1x8x16xf32> to vector<8x16xf32>
    %131 = vector.shape_cast %128 : vector<8x16xf32> to vector<1x8x16xf32>
    tpu.vector_store %arg4[%c0_124, %c0_125, %c0_126], %131 {strides = array<i32>} : memref<1x8x256xf32, #tpu.memory_space<vmem>>, vector<1x8x16xf32>,
    %132 = vector.extract_strided_slice %127 {offsets = [0, 18], sizes = [8, 16], strides = [1, 1]} : vector<8x288xf32> to vector<8x16xf32>
    %c0_127 = arith.constant 0 : index
    %c0_128 = arith.constant 0 : index
    %c16_129 = arith.constant 16 : index
    %133 = vector.load %arg4[%c0_127, %c0_128, %c16_129] : memref<1x8x256xf32, #tpu.memory_space<vmem>>, vector<1x8x16xf32>
    %134 = vector.shape_cast %133 : vector<1x8x16xf32> to vector<8x16xf32>
    %135 = vector.shape_cast %132 : vector<8x16xf32> to vector<1x8x16xf32>
    tpu.vector_store %arg4[%c0_127, %c0_128, %c16_129], %135 {strides = array<i32>} : memref<1x8x256xf32, #tpu.memory_space<vmem>>, vector<1x8x16xf32>,
    %136 = vector.extract_strided_slice %127 {offsets = [0, 36], sizes = [8, 16], strides = [1, 1]} : vector<8x288xf32> to vector<8x16xf32>
    %c0_130 = arith.constant 0 : index
    %c0_131 = arith.constant 0 : index
    %c32_132 = arith.constant 32 : index
    %137 = vector.load %arg4[%c0_130, %c0_131, %c32_132] : memref<1x8x256xf32, #tpu.memory_space<vmem>>, vector<1x8x16xf32>
    %138 = vector.shape_cast %137 : vector<1x8x16xf32> to vector<8x16xf32>
    %139 = vector.shape_cast %136 : vector<8x16xf32> to vector<1x8x16xf32>
    tpu.vector_store %arg4[%c0_130, %c0_131, %c32_132], %139 {strides = array<i32>} : memref<1x8x256xf32, #tpu.memory_space<vmem>>, vector<1x8x16xf32>,
    %140 = vector.extract_strided_slice %127 {offsets = [0, 54], sizes = [8, 16], strides = [1, 1]} : vector<8x288xf32> to vector<8x16xf32>
    %c0_133 = arith.constant 0 : index
    %c0_134 = arith.constant 0 : index
    %c48 = arith.constant 48 : index
    %141 = vector.load %arg4[%c0_133, %c0_134, %c48] : memref<1x8x256xf32, #tpu.memory_space<vmem>>, vector<1x8x16xf32>
    %142 = vector.shape_cast %141 : vector<1x8x16xf32> to vector<8x16xf32>
    %143 = vector.shape_cast %140 : vector<8x16xf32> to vector<1x8x16xf32>
    tpu.vector_store %arg4[%c0_133, %c0_134, %c48], %143 {strides = array<i32>} : memref<1x8x256xf32, #tpu.memory_space<vmem>>, vector<1x8x16xf32>,
    %144 = vector.extract_strided_slice %127 {offsets = [0, 72], sizes = [8, 16], strides = [1, 1]} : vector<8x288xf32> to vector<8x16xf32>
    %c0_135 = arith.constant 0 : index
    %c0_136 = arith.constant 0 : index
    %c64 = arith.constant 64 : index
    %145 = vector.load %arg4[%c0_135, %c0_136, %c64] : memref<1x8x256xf32, #tpu.memory_space<vmem>>, vector<1x8x16xf32>
    %146 = vector.shape_cast %145 : vector<1x8x16xf32> to vector<8x16xf32>
    %147 = vector.shape_cast %144 : vector<8x16xf32> to vector<1x8x16xf32>
    tpu.vector_store %arg4[%c0_135, %c0_136, %c64], %147 {strides = array<i32>} : memref<1x8x256xf32, #tpu.memory_space<vmem>>, vector<1x8x16xf32>,
    %148 = vector.extract_strided_slice %127 {offsets = [0, 90], sizes = [8, 16], strides = [1, 1]} : vector<8x288xf32> to vector<8x16xf32>
    %c0_137 = arith.constant 0 : index
    %c0_138 = arith.constant 0 : index
    %c80 = arith.constant 80 : index
    %149 = vector.load %arg4[%c0_137, %c0_138, %c80] : memref<1x8x256xf32, #tpu.memory_space<vmem>>, vector<1x8x16xf32>
    %150 = vector.shape_cast %149 : vector<1x8x16xf32> to vector<8x16xf32>
    %151 = vector.shape_cast %148 : vector<8x16xf32> to vector<1x8x16xf32>
    tpu.vector_store %arg4[%c0_137, %c0_138, %c80], %151 {strides = array<i32>} : memref<1x8x256xf32, #tpu.memory_space<vmem>>, vector<1x8x16xf32>,
    %152 = vector.extract_strided_slice %127 {offsets = [0, 108], sizes = [8, 16], strides = [1, 1]} : vector<8x288xf32> to vector<8x16xf32>
    %c0_139 = arith.constant 0 : index
    %c0_140 = arith.constant 0 : index
    %c96 = arith.constant 96 : index
    %153 = vector.load %arg4[%c0_139, %c0_140, %c96] : memref<1x8x256xf32, #tpu.memory_space<vmem>>, vector<1x8x16xf32>
    %154 = vector.shape_cast %153 : vector<1x8x16xf32> to vector<8x16xf32>
    %155 = vector.shape_cast %152 : vector<8x16xf32> to vector<1x8x16xf32>
    tpu.vector_store %arg4[%c0_139, %c0_140, %c96], %155 {strides = array<i32>} : memref<1x8x256xf32, #tpu.memory_space<vmem>>, vector<1x8x16xf32>,
    %156 = vector.extract_strided_slice %127 {offsets = [0, 126], sizes = [8, 16], strides = [1, 1]} : vector<8x288xf32> to vector<8x16xf32>
    %c0_141 = arith.constant 0 : index
    %c0_142 = arith.constant 0 : index
    %c112 = arith.constant 112 : index
    %157 = vector.load %arg4[%c0_141, %c0_142, %c112] : memref<1x8x256xf32, #tpu.memory_space<vmem>>, vector<1x8x16xf32>
    %158 = vector.shape_cast %157 : vector<1x8x16xf32> to vector<8x16xf32>
    %159 = vector.shape_cast %156 : vector<8x16xf32> to vector<1x8x16xf32>
    tpu.vector_store %arg4[%c0_141, %c0_142, %c112], %159 {strides = array<i32>} : memref<1x8x256xf32, #tpu.memory_space<vmem>>, vector<1x8x16xf32>,
    %160 = vector.extract_strided_slice %127 {offsets = [0, 144], sizes = [8, 16], strides = [1, 1]} : vector<8x288xf32> to vector<8x16xf32>
    %c0_143 = arith.constant 0 : index
    %c0_144 = arith.constant 0 : index
    %c128_145 = arith.constant 128 : index
    %161 = vector.load %arg4[%c0_143, %c0_144, %c128_145] : memref<1x8x256xf32, #tpu.memory_space<vmem>>, vector<1x8x16xf32>
    %162 = vector.shape_cast %161 : vector<1x8x16xf32> to vector<8x16xf32>
    %163 = vector.shape_cast %160 : vector<8x16xf32> to vector<1x8x16xf32>
    tpu.vector_store %arg4[%c0_143, %c0_144, %c128_145], %163 {strides = array<i32>} : memref<1x8x256xf32, #tpu.memory_space<vmem>>, vector<1x8x16xf32>,
    %164 = vector.extract_strided_slice %127 {offsets = [0, 162], sizes = [8, 16], strides = [1, 1]} : vector<8x288xf32> to vector<8x16xf32>
    %c0_146 = arith.constant 0 : index
    %c0_147 = arith.constant 0 : index
    %c144_148 = arith.constant 144 : index
    %165 = vector.load %arg4[%c0_146, %c0_147, %c144_148] : memref<1x8x256xf32, #tpu.memory_space<vmem>>, vector<1x8x16xf32>
    %166 = vector.shape_cast %165 : vector<1x8x16xf32> to vector<8x16xf32>
    %167 = vector.shape_cast %164 : vector<8x16xf32> to vector<1x8x16xf32>
    tpu.vector_store %arg4[%c0_146, %c0_147, %c144_148], %167 {strides = array<i32>} : memref<1x8x256xf32, #tpu.memory_space<vmem>>, vector<1x8x16xf32>,
    %168 = vector.extract_strided_slice %127 {offsets = [0, 180], sizes = [8, 16], strides = [1, 1]} : vector<8x288xf32> to vector<8x16xf32>
    %c0_149 = arith.constant 0 : index
    %c0_150 = arith.constant 0 : index
    %c160 = arith.constant 160 : index
    %169 = vector.load %arg4[%c0_149, %c0_150, %c160] : memref<1x8x256xf32, #tpu.memory_space<vmem>>, vector<1x8x16xf32>
    %170 = vector.shape_cast %169 : vector<1x8x16xf32> to vector<8x16xf32>
    %171 = vector.shape_cast %168 : vector<8x16xf32> to vector<1x8x16xf32>
    tpu.vector_store %arg4[%c0_149, %c0_150, %c160], %171 {strides = array<i32>} : memref<1x8x256xf32, #tpu.memory_space<vmem>>, vector<1x8x16xf32>,
    %172 = vector.extract_strided_slice %127 {offsets = [0, 198], sizes = [8, 16], strides = [1, 1]} : vector<8x288xf32> to vector<8x16xf32>
    %c0_151 = arith.constant 0 : index
    %c0_152 = arith.constant 0 : index
    %c176 = arith.constant 176 : index
    %173 = vector.load %arg4[%c0_151, %c0_152, %c176] : memref<1x8x256xf32, #tpu.memory_space<vmem>>, vector<1x8x16xf32>
    %174 = vector.shape_cast %173 : vector<1x8x16xf32> to vector<8x16xf32>
    %175 = vector.shape_cast %172 : vector<8x16xf32> to vector<1x8x16xf32>
    tpu.vector_store %arg4[%c0_151, %c0_152, %c176], %175 {strides = array<i32>} : memref<1x8x256xf32, #tpu.memory_space<vmem>>, vector<1x8x16xf32>,
    %176 = vector.extract_strided_slice %127 {offsets = [0, 216], sizes = [8, 16], strides = [1, 1]} : vector<8x288xf32> to vector<8x16xf32>
    %c0_153 = arith.constant 0 : index
    %c0_154 = arith.constant 0 : index
    %c192 = arith.constant 192 : index
    %177 = vector.load %arg4[%c0_153, %c0_154, %c192] : memref<1x8x256xf32, #tpu.memory_space<vmem>>, vector<1x8x16xf32>
    %178 = vector.shape_cast %177 : vector<1x8x16xf32> to vector<8x16xf32>
    %179 = vector.shape_cast %176 : vector<8x16xf32> to vector<1x8x16xf32>
    tpu.vector_store %arg4[%c0_153, %c0_154, %c192], %179 {strides = array<i32>} : memref<1x8x256xf32, #tpu.memory_space<vmem>>, vector<1x8x16xf32>,
    %180 = vector.extract_strided_slice %127 {offsets = [0, 234], sizes = [8, 16], strides = [1, 1]} : vector<8x288xf32> to vector<8x16xf32>
    %c0_155 = arith.constant 0 : index
    %c0_156 = arith.constant 0 : index
    %c208 = arith.constant 208 : index
    %181 = vector.load %arg4[%c0_155, %c0_156, %c208] : memref<1x8x256xf32, #tpu.memory_space<vmem>>, vector<1x8x16xf32>
    %182 = vector.shape_cast %181 : vector<1x8x16xf32> to vector<8x16xf32>
    %183 = vector.shape_cast %180 : vector<8x16xf32> to vector<1x8x16xf32>
    tpu.vector_store %arg4[%c0_155, %c0_156, %c208], %183 {strides = array<i32>} : memref<1x8x256xf32, #tpu.memory_space<vmem>>, vector<1x8x16xf32>,
    %184 = vector.extract_strided_slice %127 {offsets = [0, 252], sizes = [8, 16], strides = [1, 1]} : vector<8x288xf32> to vector<8x16xf32>
    %c0_157 = arith.constant 0 : index
    %c0_158 = arith.constant 0 : index
    %c224 = arith.constant 224 : index
    %185 = vector.load %arg4[%c0_157, %c0_158, %c224] : memref<1x8x256xf32, #tpu.memory_space<vmem>>, vector<1x8x16xf32>
    %186 = vector.shape_cast %185 : vector<1x8x16xf32> to vector<8x16xf32>
    %187 = vector.shape_cast %184 : vector<8x16xf32> to vector<1x8x16xf32>
    tpu.vector_store %arg4[%c0_157, %c0_158, %c224], %187 {strides = array<i32>} : memref<1x8x256xf32, #tpu.memory_space<vmem>>, vector<1x8x16xf32>,
    %188 = vector.extract_strided_slice %127 {offsets = [0, 270], sizes = [8, 16], strides = [1, 1]} : vector<8x288xf32> to vector<8x16xf32>
    %c0_159 = arith.constant 0 : index
    %c0_160 = arith.constant 0 : index
    %c240 = arith.constant 240 : index
    %189 = vector.load %arg4[%c0_159, %c0_160, %c240] : memref<1x8x256xf32, #tpu.memory_space<vmem>>, vector<1x8x16xf32>
    %190 = vector.shape_cast %189 : vector<1x8x16xf32> to vector<8x16xf32>
    %191 = vector.shape_cast %188 : vector<8x16xf32> to vector<1x8x16xf32>
    tpu.vector_store %arg4[%c0_159, %c0_160, %c240], %191 {strides = array<i32>} : memref<1x8x256xf32, #tpu.memory_space<vmem>>, vector<1x8x16xf32>,
    return
  }
  func.func @transform_0(%arg0: i32) -> (i32, i32, i32) {
    %c0_i32 = arith.constant 0 : i32
    %c0_i32_0 = arith.constant 0 : i32
    %c0_i32_1 = arith.constant 0 : i32
    return %arg0, %c0_i32, %c0_i32_0 : i32, i32, i32
  }
  func.func @transform_1(%arg0: i32) -> (i32, i32) {
    %c0_i32 = arith.constant 0 : i32
    %c0_i32_0 = arith.constant 0 : i32
    %c0_i32_1 = arith.constant 0 : i32
    return %c0_i32, %c0_i32_0 : i32, i32
  }
  func.func @transform_2(%arg0: i32) -> (i32, i32) {
    %c0_i32 = arith.constant 0 : i32
    %c0_i32_0 = arith.constant 0 : i32
    %c0_i32_1 = arith.constant 0 : i32
    return %c0_i32, %c0_i32_0 : i32, i32
  }
  func.func @transform_3(%arg0: i32) -> (i32, i32, i32) {
    %c0_i32 = arith.constant 0 : i32
    %c0_i32_0 = arith.constant 0 : i32
    %c0_i32_1 = arith.constant 0 : i32
    return %arg0, %c0_i32, %c0_i32_0 : i32, i32, i32
  }
}

</mosaic_0001>

<bundles_post_ra>
// kernel: tpu_custom_call.1
= control target key start
LH: loop header
LB: loop body
LE: loop exit
PB: predicated region body
PF: predicated region fallthrough
CT: control target
= control target key end

     0   :  { %8 = vsyncpa [#allocation5], 0  ;;  %s1660_s0 = inlined_call_operand.hbm [shape: f32[2,4,256], index: 0, kind: input, shape index: {}]   ;;  %s1661_s1 = inlined_call_operand.vmem [shape: f32[8,36], index: 1, kind: input, shape index: {}]   ;;  %s1662_s2 = inlined_call_operand.vmem [shape: f32[8,1], index: 2, kind: input, shape index: {}]   ;;  %s1663_s3 = inlined_call_operand.hbm [shape: f32[2,8,256], index: 3, kind: output, shape index: {}]  }
   0x1   :  { %10 = vsyncpa [#allocation5 + $0x1], 0 }
   0x2   :  { %11 = vsyncpa [#allocation6], 0 }
   0x3   :  { %13 = vsyncpa [#allocation6 + $0x1], 0  ;;  %s1363_s12 = smov 0   ;;  %s1365_s13 = smov 0  }
   0x4   :  { %s1367_s14 = smov 0   ;;  %s1369_s15 = smov 0  }
   0x5 LB: > { %s1384_s16 = sadd.s32 4294967295, %s1297_s15   ;;  %s1052_s17 = sadd.s32 4294967294, %s1297_s15   ;;  %s1297_s15 = sphi %s1369_s15, %s1678_s15   ;;  %s1293_s14 = sphi %s1367_s14, %s1677_s14   ;;  %s1289_s13 = sphi %s1365_s13, %s1676_s13   ;;  %s1285_s12 = sphi %s1363_s12, %s1675_s12  }
   0x6   : > { %s1388_s18 = sadd.s32 1, %s1297_s15   ;;  %s26_s19 = sadd.s32 1, %s1293_s14 }
   0x7   : > { %s23_s20 = ssub.s32 %s1297_s15, %s1388_s18  ;;  %p33_p0 = scmp.ne.s32.totalorder %s1293_s14, %s1289_s13 }
   0x8   : > { %p24_p1 = scmp.eq.s32.totalorder %s23_s20, 0  ;;  %p34_p2 = scmp.eq.s32.totalorder %s1297_s15, 0 }
   0x9   : > { %p39_p3 = scmp.ne.s32.totalorder %s1289_s13, %s1285_s12  ;;  %p40_p4 = scmp.eq.s32.totalorder %s1384_s16, 0 }
   0xa   : > { %s1400_s21 = scalar_select %p24_p1, %s1293_s14, %s26_s19  }
   0xb   : > { %p1402_p5 = por %p34_p2, %p33_p0  ;;  %p1406_p6 = por %p40_p4, %p39_p3 }
   0xc   : > { %p105_p7 = scmp.eq.s32.totalorder %s1384_s16, 1  ;;  %p111_p8 = scmp.eq.s32.totalorder %s1052_s17, 1 }
   0xd   : > { %p1118_p10 = scmp.lt.s32.totalorder %s1297_s15, 2  ;;  %s137_s26 = sand.u32 1, %s1293_s14  }
   0xe   : > { %p1413_p11 = por %p105_p7, %p33_p0  ;;  %p1417_p12 = por %p111_p8, %p39_p3 }
   0xf   : > { %s1071_s27 = sshll.u32 %s1297_s15, 7  ;;  %s1055_s28 = sshll.u32 %s137_s26, 3 }
  0x10   : > { %s1667_s24 = scalar_select %p1413_p11, 1, 0 }
  0x11   : > { %s1668_s25 = scalar_select %p1417_p12, 1, 0 }
  0x12   : > { %s1426_s4 = scalar_lea.hbm %s1660_s0, %s1071_s27  ;;  %s141_s5 = scalar_lea.vmem [#allocation4], %s1055_s28 }
  0x13   : > { %s149_s6 = sshll.u32 %s141_s5, 4  ;;  %p1430_p13 = pnand %p1118_p10, %p1402_p5  ;;  %s1434_s6 = int_to_ptr.vmem [resolvable:$true] %s149_s6 }
  0x14   : > { %s138_s8 = scalar_lea.sflag [#allocation5], %s137_s26  ;;  %s1201_s9 = scalar_lea.hbm %s1426_s4, 128 }
  0x15   : > { %p1202_p2 = scmp.ne.s32.totalorder %s1426_s4, %s1201_s9  ;;  %p1203_p3 = pneg %p1430_p13 }
  0x16   : > { %s1206_s17 = scalar_lea.hbm %s1660_s0, 256  ;;  %p1207_p5 = scmp.lt.u32.totalorder %s1426_s4, %s1660_s0 }
  0x17   : > { %p1204_p4 = pnand %p1203_p3, %p1202_p2  ;;  %p1208_p8 = scmp.lt.u32.totalorder %s1206_s17, %s1201_s9 }
  0x18   : > { %p1210_p9 = scmp.lt.u32.totalorder %s1201_s9, %s1426_s4 }
  0x19   : > { %p1205_p7 = pneg %p1204_p4  ;;  %p1209_p10 = por %p1208_p8, %p1207_p5 }
  0x1b   : > { %p1211_p0 = por %p1210_p9, %p1209_p10 }
  0x1d   : > { %p1212_p1 = pnand %p1211_p0, %p1205_p7 }
  0x1f   : > { %1215 = shalt.err (!%p1212_p1)
}
  0x20   : > { %s1216_s22 = scalar_lea.vmem %s1434_s6, 128  ;;  %s1299_s26 = smov [#allocation4]  }
  0x21   : > { %p1217_p2 = scmp.ne.s32.totalorder %s1434_s6, %s1216_s22  ;;  %s1221_s27 = sshll.u32 %s1299_s26, 4  ;;  %s1222_s27 = int_to_ptr.vmem [resolvable:$false] %s1221_s27 }
  0x22   : > { %s1223_s28 = scalar_lea.vmem %s1222_s27, 256  ;;  %p1224_p11 = scmp.lt.s32.totalorder %s1434_s6, %s1222_s27 }
  0x23   : > { %p1219_p4 = pnand %p1217_p2, %p1203_p3  ;;  %p1225_p5 = scmp.lt.s32.totalorder %s1223_s28, %s1216_s22 }
  0x25   : > { %p1220_p12 = pneg %p1219_p4  ;;  %p1226_p8 = por %p1225_p5, %p1224_p11 }
  0x27   : > { %p1227_p9 = pnand %p1226_p8, %p1220_p12 }
  0x29   : > { %1230 = shalt.err (!%p1227_p9)
}
  0x2a   : > { %1113 = dma.hbm_to_vmem [thread:$0]  (!%p1430_p13), %s1426_s4, 128, %s1434_s6, %s138_s8  }
  0x2b   : > { %p1670_p0 = scmp.lt.s32.totalorder %s1297_s15, 3  ;;  %p1671_p1 = scmp.ge.s32.totalorder %s1297_s15, 1 }
  0x2d   : > { %p155_p3 = pnand %p1671_p1, %p1670_p0 }
  0x2e   : > { %s1468_s29 = sand.u32 (!%p155_p3), 1, %s1289_s13  }
  0x2f   : > { %158 = sbr.rel (%p155_p3) target bundleno = 4561 (0x11d1), region = 32  ;;  %s1059_s30 = sshll.u32 (!%p155_p3), %s1468_s29, 3 }
  0x30   : > { %s161_s5 = scalar_lea.sflag (!%p155_p3), [#allocation5], %s1468_s29  ;;  %s164_s9 = scalar_lea.vmem (!%p155_p3), [#allocation4], %s1059_s30 }
  0x36   : > { %1276 = dma.done.wait (%p1406_p6), %s161_s5, 128  }
  0x37   : > { %1278 = vsyncadd (%p1406_p6), %s161_s5, 4294967168  ;;  %v1476_v0 = vld [vmem:[%s164_s9] sm:$0xff]  ;;  %s1300_s4 = smov 19   ;;  %vm192_vm0 = vcmask 281752   ;;  %s1301_s6 = smov 126   ;;  %vm199_vm1 = vcmask 150672  }
  0x38   : > { %189 = vrot.lane.b32.xlu0 %v1476_v0, %s1300_s4  ;;  %s1302_s7 = smov 2   ;;  %s1303_s23 = smov 21   ;;  %vm206_vm2 = vcmask 290072   ;;  %vm211_vm3 = vcmask 429352   ;;  %vm218_vm4 = vcmask 298272   ;;  %vm225_vm5 = vcmask 437672  }
  0x39   : > { %s1304_s8 = smov 23   ;;  %vm230_vm6 = vcmask 576952   ;;  %s1305_s10 = smov 25   ;;  %vm237_vm7 = vcmask 445872   ;;  %vm244_vm8 = vcmask 585272   ;;  %vm249_vm9 = vcmask 724552  }
  0x3a   : > { %s1306_s11 = smov 27   ;;  %vm256_vm10 = vcmask 593472   ;;  %vm263_vm11 = vcmask 732872   ;;  %vm268_vm12 = vcmask 872152   ;;  %s1307_s17 = smov 29   ;;  %vm275_vm13 = vcmask 741072  }
  0x3b   : > { %s1308_s19 = smov 31   ;;  %vm282_vm14 = vcmask 880472   ;;  %vm287_vm15 = vcmask 1019752   ;;  %s1309_s20 = smov 33  }
  0x3c   : > { %s1310_s22 = smov 35   ;;  %s1311_s26 = smov 37  }
  0x3d   : > { %s1312_s27 = smov 39   ;;  %s1313_s28 = smov 41  }
  0x3e   : > { %s1314_s30 = smov 43   ;;  %s1315_s5 = smov 45  }
  0x3f   : > { %s1316_s9 = smov 47   ;;  %s1317_s4 = smov 49  }
  0x40   : > { %p1672_p11 = scmp.ne.s32.totalorder %s1667_s24, 0 }
  0xaa   : > { %v190_v1 = vpop.permute.xlu0 %189 }
  0xab   : > { %193 = vst.msk [vmem:[#allocation2] sm:$0xf] %vm192_vm0, %v190_v1  ;;  %vm294_vm0 = vcmask 888672  }
  0xb2   : > { %v194_v2 = vld [vmem:[#allocation2] sm:$0xf] }
  0xb3   : > { %196 = vrot.lane.b32.xlu0 %v194_v2, %s1301_s6 }
 0x125   : > { %v197_v3 = vpop.permute.xlu0 %196 }
 0x126   : > { %200 = vst.msk [vmem:[#allocation2] sm:$0xf] %vm199_vm1, %v197_v3  ;;  %vm309_vm1 = vcmask 1044472  }
 0x12d   : > { %v201_v4 = vld [vmem:[#allocation2] sm:$0xf] }
 0x12e   : > { %203 = vrot.lane.b32.xlu1 %v201_v4, %s1302_s7 }
 0x132   : > { %208 = vrot.lane.b32.xlu1 %v1476_v0, %s1303_s23  ;;  %s1318_s23 = smov 36  }
 0x1a0   : > { %v204_v5 = vpop.permute.xlu1 %203 }
 0x1a1   : > { %207 = vst.msk [vmem:[#allocation2] sm:$0xf] %vm206_vm2, %v204_v5  ;;  %vm310_vm2 = vcmask 121860  }
 0x1a4   : > { %v209_v6 = vpop.permute.xlu1 %208 }
 0x1a5   : > { %212 = vst.msk [vmem:[#allocation2] sm:$0xf] %vm211_vm3, %v209_v6  ;;  %vm306_vm3 = vcmask 252928  }
 0x1ac   : > { %v213_v7 = vld [vmem:[#allocation2] sm:$0xf] }
 0x1ad   : > { %215 = vrot.lane.b32.xlu0 %v213_v7, %s1301_s6 }
 0x1b1   : > { %227 = vrot.lane.b32.xlu0 %v1476_v0, %s1304_s8  ;;  %s1319_s8 = smov 92  }
 0x21f   : > { %v216_v8 = vpop.permute.xlu0 %215 }
 0x220   : > { %219 = vst.msk [vmem:[#allocation2] sm:$0xf] %vm218_vm4, %v216_v8  ;;  %vm301_vm4 = vcmask 1028072  }
 0x223   : > { %v228_v10 = vpop.permute.xlu0 %227 }
 0x227   : > { %v220_v9 = vld [vmem:[#allocation2] sm:$0xf] }
 0x228   : > { %222 = vrot.lane.b32.xlu1 %v220_v9, %s1302_s7 }
 0x29a   : > { %v223_v11 = vpop.permute.xlu1 %222 }
 0x29b   : > { %226 = vst.msk [vmem:[#allocation2] sm:$0xf] %vm225_vm5, %v223_v11  ;;  %vm311_vm5 = vmor %vm310_vm2, %vm309_vm1  ;;  %vm393_vm1 = vcmask 318464   ;;  %vm388_vm2 = vcmask 568872  }
 0x29c   : > { %231 = vst.msk [vmem:[#allocation2] sm:$0xf] %vm230_vm6, %v228_v10  ;;  %vm325_vm6 = vcmask 126072  }
 0x2a3   : > { %v232_v12 = vld [vmem:[#allocation2] sm:$0xf] }
 0x2a4   : > { %234 = vrot.lane.b32.xlu1 %v232_v12, %s1301_s6 }
 0x2a8   : > { %246 = vrot.lane.b32.xlu1 %v1476_v0, %s1305_s10  ;;  %s1322_s10 = smov 109  }
 0x316   : > { %v235_v13 = vpop.permute.xlu1 %234 }
 0x317   : > { %238 = vst.msk [vmem:[#allocation2] sm:$0xf] %vm237_vm7, %v235_v13  ;;  %vm330_vm7 = vcmask 265352  }
 0x31a   : > { %v247_v15 = vpop.permute.xlu1 %246 }
 0x31e   : > { %v239_v14 = vld [vmem:[#allocation2] sm:$0xf] }
 0x31f   : > { %241 = vrot.lane.b32.xlu0 %v239_v14, %s1302_s7 }
 0x391   : > { %v242_v16 = vpop.permute.xlu0 %241 }
 0x392   : > { %245 = vst.msk [vmem:[#allocation2] sm:$0xf] %vm244_vm8, %v242_v16  ;;  %vm337_vm8 = vcmask 134272  }
 0x393   : > { %250 = vst.msk [vmem:[#allocation2] sm:$0xf] %vm249_vm9, %v247_v15  ;;  %vm349_vm9 = vcmask 285696  }
 0x39a   : > { %v251_v17 = vld [vmem:[#allocation2] sm:$0xf] }
 0x39b   : > { %253 = vrot.lane.b32.xlu0 %v251_v17, %s1301_s6 }
 0x39f   : > { %265 = vrot.lane.b32.xlu0 %v1476_v0, %s1306_s11  ;;  %s1323_s11 = smov 108  }
 0x40d   : > { %v254_v18 = vpop.permute.xlu0 %253 }
 0x40e   : > { %257 = vst.msk [vmem:[#allocation2] sm:$0xf] %vm256_vm10, %v254_v18  ;;  %vm344_vm10 = vcmask 273672  }
 0x411   : > { %v266_v20 = vpop.permute.xlu0 %265 }
 0x415   : > { %v258_v19 = vld [vmem:[#allocation2] sm:$0xf] }
 0x416   : > { %260 = vrot.lane.b32.xlu1 %v258_v19, %s1302_s7 }
 0x488   : > { %v261_v21 = vpop.permute.xlu1 %260 }
 0x489   : > { %264 = vst.msk [vmem:[#allocation2] sm:$0xf] %vm263_vm11, %v261_v21  ;;  %vm352_vm11 = vcmask 412952  }
 0x48a   : > { %269 = vst.msk [vmem:[#allocation2] sm:$0xf] %vm268_vm12, %v266_v20  ;;  %vm359_vm12 = vcmask 281872  }
 0x491   : > { %v270_v22 = vld [vmem:[#allocation2] sm:$0xf] }
 0x492   : > { %272 = vrot.lane.b32.xlu1 %v270_v22, %s1301_s6 }
 0x496   : > { %284 = vrot.lane.b32.xlu1 %v1476_v0, %s1307_s17  ;;  %s1324_s17 = smov 110  }
 0x49a   : > { %303 = vrot.lane.b32.xlu1 %v1476_v0, %s1308_s19  ;;  %s1325_s19 = smov 91  }
 0x504   : > { %v273_v23 = vpop.permute.xlu1 %272 }
 0x505   : > { %276 = vst.msk [vmem:[#allocation2] sm:$0xf] %vm275_vm13, %v273_v23  ;;  %vm371_vm13 = vcmask 302080  }
 0x508   : > { %v285_v25 = vpop.permute.xlu1 %284 }
 0x50c   : > { %v277_v24 = vld [vmem:[#allocation2] sm:$0xf]  ;;  %v304_v30 = vpop.permute.xlu1 %303 }
 0x50d   : > { %279 = vrot.lane.b32.xlu0 %v277_v24, %s1302_s7  ;;  %v305_v31 = vrot.slane %v304_v30, 4 }
 0x50f   : > { %v307_v33 = vsel %vm306_vm3, %v305_v31, %v304_v30  ;;  %vm396_vm3 = vcmask 708152  }
 0x57f   : > { %v280_v26 = vpop.permute.xlu0 %279 }
 0x580   : > { %283 = vst.msk [vmem:[#allocation2] sm:$0xf] %vm282_vm14, %v280_v26  ;;  %vm366_vm14 = vcmask 421272  }
 0x581   : > { %288 = vst.msk [vmem:[#allocation2] sm:$0xf] %vm287_vm15, %v285_v25  ;;  %vm374_vm15 = vcmask 560552  }
 0x588   : > { %v289_v27 = vld [vmem:[#allocation2] sm:$0xf] }
 0x589   : > { %291 = vrot.lane.b32.xlu0 %v289_v27, %s1301_s6 }
 0x5fb   : > { %v292_v28 = vpop.permute.xlu0 %291 }
 0x5fc   : > { %295 = vst.msk [vmem:[#allocation2] sm:$0xf] %vm294_vm0, %v292_v28  ;;  %vm381_vm0 = vcmask 429472  }
 0x603   : > { %v296_v29 = vld [vmem:[#allocation2] sm:$0xf] }
 0x604   : > { %298 = vrot.lane.b32.xlu0 %v296_v29, %s1302_s7 }
 0x608   : > { %327 = vrot.lane.b32.xlu0 %v1476_v0, %s1309_s20  ;;  %s1328_s20 = smov 90  }
 0x60c   : > { %346 = vrot.lane.b32.xlu0 %v1476_v0, %s1310_s22  ;;  %s1339_s22 = smov 102  }
 0x676   : > { %v299_v32 = vpop.permute.xlu0 %298 }
 0x677   : > { %302 = vst.msk [vmem:[#allocation2] sm:$0xf] %vm301_vm4, %v299_v32  ;;  %vm403_vm4 = vcmask 577072  }
 0x678   : > { %312 = vst.msk [vmem:[#allocation2] sm:$0xff] %vm311_vm5, %v307_v33  ;;  %vm415_vm5 = vcmask 334848  }
 0x67a   : > { %v328_v35 = vpop.permute.xlu0 %327 }
 0x67e   : > { %v347_v41 = vpop.permute.xlu0 %346 }
 0x67f   : > { %v320_v34 = vld [vmem:[#allocation2 + $0x4] sm:$0xf]  ;;  %v348_v42 = vrot.slane %v347_v41, 4 }
 0x680   : > { %322 = vrot.lane.b32.xlu1 %v320_v34, %s1302_s7  ;;  %v1499_v37 = vld [vmem:[#allocation2 + $0x4] sm:$0xf] }
 0x681   : > { %v350_v44 = vsel %vm349_vm9, %v347_v41, %v348_v42  ;;  %vm437_vm9 = vcmask 351232  }
 0x6f2   : > { %v323_v36 = vpop.permute.xlu1 %322 }
 0x6f3   : > { %326 = vst.msk [vmem:[#allocation2 + $0x4] sm:$0xf] %vm325_vm6, %v323_v36  ;;  %vm410_vm6 = vcmask 716472  }
 0x6f4   : > { %331 = vst.msk [vmem:[#allocation2 + $0x4] sm:$0xf] %vm330_vm7, %v328_v35  ;;  %vm418_vm7 = vcmask 855752   ;;  %v1320_v35 = vmov 0.0  }
 0x6f5   : > { %810 = vmatprep.mubr.f32.mxu0 %v1320_v35 }
 0x6fb   : > { %v332_v38 = vld [vmem:[#allocation2 + $0x4] sm:$0xf] }
 0x6fc   : > { %334 = vrot.lane.b32.xlu1 %v332_v38, %s1301_s6 }
 0x76e   : > { %v335_v39 = vpop.permute.xlu1 %334 }
 0x76f   : > { %338 = vst.msk [vmem:[#allocation2 + $0x4] sm:$0xf] %vm337_vm8, %v335_v39  ;;  %vm425_vm8 = vcmask 724672  }
 0x776   : > { %v339_v40 = vld [vmem:[#allocation2 + $0x4] sm:$0xf] }
 0x777   : > { %341 = vrot.lane.b32.xlu1 %v339_v40, %s1302_s7 }
 0x77b   : > { %368 = vrot.lane.b32.xlu1 %v1476_v0, %s1311_s26  ;;  %s1340_s26 = smov 112  }
 0x7e9   : > { %v342_v43 = vpop.permute.xlu1 %341 }
 0x7ea   : > { %345 = vst.msk [vmem:[#allocation2 + $0x4] sm:$0xf] %vm344_vm10, %v342_v43  ;;  %vm432_vm10 = vcmask 864072  }
 0x7eb   : > { %353 = vst.msk [vmem:[#allocation2 + $0x4] sm:$0xf] %vm352_vm11, %v350_v44  ;;  %vm440_vm11 = vcmask 1003352  }
 0x7ed   : > { %v369_v48 = vpop.permute.xlu1 %368 }
 0x7ee   : > { %v370_v49 = vrot.slane %v369_v48, 4 }
 0x7f0   : > { %v372_v51 = vsel %vm371_vm13, %v369_v48, %v370_v49  ;;  %vm462_vm13 = vcmask 1044456   ;;  %v1326_v48 = vmov 0.0|0.0  }
 0x7f1   : > { %1100 = vmatprep.subr.bf16.mxu1 %v1326_v48 }
 0x7f2   : > { %v354_v45 = vld [vmem:[#allocation2 + $0x4] sm:$0xf] }
 0x7f3   : > { %356 = vrot.lane.b32.xlu0 %v354_v45, %s1301_s6 }
 0x865   : > { %v357_v46 = vpop.permute.xlu0 %356 }
 0x866   : > { %360 = vst.msk [vmem:[#allocation2 + $0x4] sm:$0xf] %vm359_vm12, %v357_v46  ;;  %vm447_vm12 = vcmask 872272  }
 0x86d   : > { %v361_v47 = vld [vmem:[#allocation2 + $0x4] sm:$0xf] }
 0x86e   : > { %363 = vrot.lane.b32.xlu0 %v361_v47, %s1302_s7 }
 0x872   : > { %390 = vrot.lane.b32.xlu0 %v1476_v0, %s1312_s27 }
 0x8e0   : > { %v364_v50 = vpop.permute.xlu0 %363 }
 0x8e1   : > { %367 = vst.msk [vmem:[#allocation2 + $0x4] sm:$0xf] %vm366_vm14, %v364_v50  ;;  %vm463_vm14 = vcmask 105476  }
 0x8e2   : > { %375 = vst.msk [vmem:[#allocation2 + $0x4] sm:$0xf] %vm374_vm15, %v372_v51  ;;  %vm459_vm15 = vcmask 367616   ;;  %v1329_v51 = vmov 0  }
 0x8e3   : > { %1194 = vset.pattern.permute.xlu0 %v1329_v51 }
 0x8e4   : > { %v391_v55 = vpop.permute.xlu0 %390 }
 0x8e5   : > { %v392_v56 = vrot.slane %v391_v55, 4 }
 0x8e7   : > { %v394_v58 = vsel %vm393_vm1, %v391_v55, %v392_v56  ;;  %vm464_vm1 = vmor %vm463_vm14, %vm462_vm13  ;;  %vm525_vm13 = vcmask 142336   ;;  %vm543_vm14 = vcmask 257024  }
 0x8e9   : > { %v376_v52 = vld [vmem:[#allocation2 + $0x4] sm:$0xf] }
 0x8ea   : > { %378 = vrot.lane.b32.xlu1 %v376_v52, %s1301_s6  ;;  %v726_v52 = vld [vmem:[%s1662_s2] sm:$0xff] }
 0x95c   : > { %v379_v53 = vpop.permute.xlu1 %378 }
 0x95d   : > { %382 = vst.msk [vmem:[#allocation2 + $0x4] sm:$0xf] %vm381_vm0, %v379_v53  ;;  %vm454_vm0 = vcmask 1011672  }
 0x964   : > { %v383_v54 = vld [vmem:[#allocation2 + $0x4] sm:$0xf] }
 0x965   : > { %385 = vrot.lane.b32.xlu1 %v383_v54, %s1302_s7 }
 0x969   : > { %412 = vrot.lane.b32.xlu1 %v1476_v0, %s1313_s28 }
 0x9d7   : > { %v386_v57 = vpop.permute.xlu1 %385 }
 0x9d8   : > { %389 = vst.msk [vmem:[#allocation2 + $0x4] sm:$0xf] %vm388_vm2, %v386_v57  ;;  %vm478_vm2 = vcmask 109672  }
 0x9d9   : > { %397 = vst.msk [vmem:[#allocation2 + $0x4] sm:$0xf] %vm396_vm3, %v394_v58  ;;  %vm484_vm3 = vcmask 248952  }
 0x9db   : > { %v413_v62 = vpop.permute.xlu1 %412 }
 0x9dc   : > { %v414_v63 = vrot.slane %v413_v62, 4 }
 0x9de   : > { %v416_v2 = vsel %vm415_vm5, %v413_v62, %v414_v63  ;;  %vm498_vm5 = vcmask 257272  }
 0x9e0   : > { %v398_v59 = vld [vmem:[#allocation2 + $0x4] sm:$0xf] }
 0x9e1   : > { %400 = vrot.lane.b32.xlu0 %v398_v59, %s1301_s6 }
 0xa53   : > { %v401_v60 = vpop.permute.xlu0 %400 }
 0xa54   : > { %404 = vst.msk [vmem:[#allocation2 + $0x4] sm:$0xf] %vm403_vm4, %v401_v60  ;;  %vm491_vm4 = vcmask 117872  }
 0xa5b   : > { %v405_v61 = vld [vmem:[#allocation2 + $0x4] sm:$0xf] }
 0xa5c   : > { %407 = vrot.lane.b32.xlu0 %v405_v61, %s1302_s7 }
 0xa60   : > { %434 = vrot.lane.b32.xlu0 %v1476_v0, %s1314_s30  ;;  %s1060_s30 = sshll.u32 %s1468_s29, 4 }
 0xace   : > { %v408_v1 = vpop.permute.xlu0 %407 }
 0xacf   : > { %411 = vst.msk [vmem:[#allocation2 + $0x4] sm:$0xf] %vm410_vm6, %v408_v1  ;;  %vm504_vm6 = vcmask 396552  }
 0xad0   : > { %419 = vst.msk [vmem:[#allocation2 + $0x4] sm:$0xf] %vm418_vm7, %v416_v2  ;;  %vm511_vm7 = vcmask 265472  }
 0xad2   : > { %v435_v6 = vpop.permute.xlu0 %434 }
 0xad3   : > { %v436_v7 = vrot.slane %v435_v6, 4 }
 0xad5   : > { %v438_v9 = vsel %vm437_vm9, %v435_v6, %v436_v7  ;;  %vm471_vm9 = vcmask 1019872  }
 0xad7   : > { %v420_v3 = vld [vmem:[#allocation2 + $0x4] sm:$0xf] }
 0xad8   : > { %422 = vrot.lane.b32.xlu1 %v420_v3, %s1301_s6 }
 0xb4a   : > { %v423_v4 = vpop.permute.xlu1 %422 }
 0xb4b   : > { %426 = vst.msk [vmem:[#allocation2 + $0x4] sm:$0xf] %vm425_vm8, %v423_v4  ;;  %vm318_vm8 = vcmask 1036272  }
 0xb52   : > { %v427_v5 = vld [vmem:[#allocation2 + $0x4] sm:$0xf] }
 0xb53   : > { %429 = vrot.lane.b32.xlu1 %v427_v5, %s1302_s7 }
 0xb57   : > { %456 = vrot.lane.b32.xlu1 %v1476_v0, %s1315_s5  ;;  %s1330_s5 = smov 100  }
 0xb5b   : > { %480 = vrot.lane.b32.xlu1 %v1476_v0, %s1316_s9  ;;  %s1576_s9 = scalar_lea.vmem [#allocation7], %s1060_s30 }
 0xb5c   : > { %s982_s27 = sshll.u32 %s1576_s9, 4  ;;  %s1617_s27 = int_to_ptr.vmem [resolvable:$true] %s982_s27 }
 0xbc5   : > { %v430_v8 = vpop.permute.xlu1 %429 }
 0xbc6   : > { %433 = vst.msk [vmem:[#allocation2 + $0x4] sm:$0xf] %vm432_vm10, %v430_v8  ;;  %vm518_vm10 = vcmask 404872  }
 0xbc7   : > { %441 = vst.msk [vmem:[#allocation2 + $0x4] sm:$0xf] %vm440_vm11, %v438_v9  ;;  %vm532_vm11 = vcmask 552336  }
 0xbc9   : > { %v457_v13 = vpop.permute.xlu1 %456 }
 0xbca   : > { %v458_v14 = vrot.slane %v457_v13, 4 }
 0xbcc   : > { %v460_v16 = vsel %vm459_vm15, %v457_v13, %v458_v14  ;;  %vm1327_vm15 = vmmov 0  }
 0xbcd   : > { %v481_v18 = vpop.permute.xlu1 %480  ;;  %1089 = vmatprep.mubr.msk.f32.mxu1 %vm1327_vm15, %v1320_v35  ;;  %vm908_vm15 = vcmask 654848  }
 0xbce   : > { %v442_v10 = vld [vmem:[#allocation2 + $0x4] sm:$0xf]  ;;  %v482_v19 = vrot.slane %v481_v18, 4 }
 0xbcf   : > { %444 = vrot.lane.b32.xlu0 %v442_v10, %s1301_s6 }
 0xc41   : > { %v445_v11 = vpop.permute.xlu0 %444 }
 0xc42   : > { %448 = vst.msk [vmem:[#allocation2 + $0x4] sm:$0xf] %vm447_vm12, %v445_v11  ;;  %vm534_vm12 = vcmask 699936  }
 0xc49   : > { %v449_v12 = vld [vmem:[#allocation2 + $0x4] sm:$0xf] }
 0xc4a   : > { %451 = vrot.lane.b32.xlu0 %v449_v12, %s1302_s7 }
 0xcbc   : > { %v452_v15 = vpop.permute.xlu0 %451 }
 0xcbd   : > { %455 = vst.msk [vmem:[#allocation2 + $0x4] sm:$0xf] %vm454_vm0, %v452_v15  ;;  %vm578_vm0 = vcmask 1031168  }
 0xcbe   : > { %465 = vst.msk [vmem:[#allocation2 + $0x4] sm:$0xff] %vm464_vm1, %v460_v16  ;;  %vm557_vm1 = vcmask 1039360  }
 0xcc5   : > { %v473_v17 = vld [vmem:[#allocation2 + $0x8] sm:$0xf]  ;;  %v466_v27 = vld [vmem:[#allocation2 + $0x4] sm:$0xf] }
 0xcc6   : > { %475 = vrot.lane.b32.xlu0 %v473_v17, %s1302_s7 }
 0xcca   : > { %500 = vrot.lane.b32.xlu0 %v1476_v0, %s1317_s4  ;;  %s1331_s4 = smov 114  }
 0xd38   : > { %v476_v20 = vpop.permute.xlu0 %475 }
 0xd39   : > { %479 = vst.msk [vmem:[#allocation2 + $0x8] sm:$0xf] %vm478_vm2, %v476_v20  ;;  %vm599_vm2 = vcmask 900096  }
 0xd3a   : > { %485 = vst.msk [vmem:[#allocation2 + $0x8] sm:$0xf] %vm484_vm3, %v482_v19  ;;  %vm619_vm3 = vcmask 891904  }
 0xd3c   : > { %v501_v24 = vpop.permute.xlu0 %500 }
 0xd3d   : > { %v502_v25 = vrot.slane %v501_v24, 4 }
 0xd41   : > { %v486_v21 = vld [vmem:[#allocation2 + $0x8] sm:$0xf] }
 0xd42   : > { %488 = vrot.lane.b32.xlu1 %v486_v21, %s1301_s6 }
 0xdb4   : > { %v489_v22 = vpop.permute.xlu1 %488 }
 0xdb5   : > { %492 = vst.msk [vmem:[#allocation2 + $0x8] sm:$0xf] %vm491_vm4, %v489_v22  ;;  %vm640_vm4 = vcmask 883712  }
 0xdbc   : > { %v493_v23 = vld [vmem:[#allocation2 + $0x8] sm:$0xf] }
 0xdbd   : > { %495 = vrot.lane.b32.xlu1 %v493_v23, %s1302_s7 }
 0xe2f   : > { %v496_v26 = vpop.permute.xlu1 %495 }
 0xe30   : > { %499 = vst.msk [vmem:[#allocation2 + $0x8] sm:$0xf] %vm498_vm5, %v496_v26  ;;  %vm565_vm5 = vcmask 261124  }
 0xe31   : > { %505 = vst.msk [vmem:[#allocation2 + $0x8] sm:$0xf] %vm504_vm6, %v502_v25  ;;  %vm660_vm6 = vcmask 752640  }
 0xe38   : > { %v506_v0 = vld [vmem:[#allocation2 + $0x8] sm:$0xf] }
 0xe39   : > { %508 = vrot.lane.b32.xlu0 %v506_v0, %s1301_s6 }
 0xe3d   : > { %315 = vrot.lane.b32.xlu0 %v1499_v37, %s1301_s6 }
 0xe41   : > { %468 = vrot.lane.b32.xlu0 %v466_v27, %s1301_s6 }
 0xeab   : > { %v509_v28 = vpop.permute.xlu0 %508 }
 0xeac   : > { %512 = vst.msk [vmem:[#allocation2 + $0x8] sm:$0xf] %vm511_vm7, %v509_v28  ;;  %vm681_vm7 = vcmask 744448  }
 0xeaf   : > { %v316_v29 = vpop.permute.xlu0 %315 }
 0xeb0   : > { %319 = vst.msk [vmem:[#allocation2] sm:$0xf] %vm318_vm8, %v316_v29  ;;  %vm701_vm8 = vcmask 736256  }
 0xeb3   : > { %v469_v30 = vpop.permute.xlu0 %468  ;;  %v513_v31 = vld [vmem:[#allocation2 + $0x8] sm:$0xf] }
 0xeb4   : > { %472 = vst.msk [vmem:[#allocation2 + $0x4] sm:$0xf] %vm471_vm9, %v469_v30  ;;  %515 = vrot.lane.b32.xlu1 %v513_v31, %s1302_s7  ;;  %s1321_s7 = smov 127   ;;  %vm736_vm9 = vcmask 1043456  }
 0xeb7   : > { %v520_v34 = vld [vmem:[#allocation2] sm:$0xf] }
 0xf26   : > { %v516_v32 = vpop.permute.xlu1 %515 }
 0xf27   : > { %519 = vst.msk [vmem:[#allocation2 + $0x8] sm:$0xf] %vm518_vm10, %v516_v32  ;;  %vm732_vm10 = vcmask 293888  }
 0xf2e   : > { %v527_v33 = vld [vmem:[#allocation2 + $0x8] sm:$0xf] }
 0xf2f   : > { %529 = vrot.lane.b32.xlu1 %v527_v33, %s1318_s23  ;;  %s1332_s23 = smov 124  }
 0xf33   : > { %522 = vrot.lane.b32.xlu1 %v520_v34, %s1319_s8 }
 0xfa1   : > { %v530_v36 = vpop.permute.xlu1 %529 }
 0xfa2   : > { %533 = vst.msk [vmem:[#allocation2 + $0x8] sm:$0xf] %vm532_vm11, %v530_v36  ;;  %vm887_vm11 = vcmask 130048  }
 0xfa3   : > { %535 = vst.msk [vmem:[#allocation2 + $0x8] sm:$0xf] %vm534_vm12, %v1320_v35  ;;  %vm893_vm12 = vcmask 261248  }
 0xfa5   : > { %v523_v37 = vpop.permute.xlu1 %522 }
 0xfa6   : > { %526 = vst.msk [vmem:[#allocation2] sm:$0xf] %vm525_vm13, %v523_v37  ;;  %vm898_vm13 = vcmask 392448  }
 0xfaa   : > { %v537_v40 = vld [vmem:[#allocation2 + $0x8] sm:$0xf] }
 0xfab   : > { %544 = vst.msk [vmem:[#allocation3 + $0x10] sm:$0xf] %vm543_vm14, %v537_v40  ;;  %v568_v42 = vld [vmem:[#allocation2 + $0x8] sm:$0xf] }
 0xfac   : > { %v609_v43 = vld [vmem:[#allocation2 + $0x8] sm:$0xf] }
 0xfad   : > { %v567_v38 = vld [vmem:[#allocation2] sm:$0xff]  ;;  %v1197_v44 = vld [vmem:[#allocation2 + $0x8] ss:$0 sps:$4 sm:$0xff]  }
 0xfae   : > { %572 = vrot.lane.b32.xlu1 %v567_v38, %s1301_s6  ;;  %v571_v39 = vcombine.high %v567_v38, %v567_v38  ;;  %553 = vrot.lane.b32.xlu0 %v567_v38, %s1321_s7  ;;  %541 = vst [vmem:[#allocation3] sm:$0xf] %v567_v38  ;;  %v549_v41 = vcombine.low %v567_v38, %v567_v38  ;;  %v650_v45 = vld [vmem:[#allocation2 + $0x8] sm:$0xf] }
 0xfaf   : > { %v1198_v46 = vld [vmem:[#allocation2 + $0x8] ss:$0 sps:$4 sm:$0xff]  }
 0xfb0   : > { %542 = vst [vmem:[#allocation3 + $0x8] sm:$0xf] %v571_v39  ;;  %v1199_v47 = vld [vmem:[#allocation2 + $0x8] ss:$0 sps:$4 sm:$0xff]  }
 0xfb1   : > { %v1200_v49 = vld [vmem:[#allocation2 + $0x8] ss:$0 sps:$4 sm:$0xff]  }
 0xfb2   : > { %615 = vrot.lane.b32.xlu1 %v571_v39, %s1322_s10  ;;  %574 = vrot.lane.b32.xlu0 %v571_v39, %s1301_s6  ;;  %v691_v50 = vld [vmem:[#allocation2 + $0x8] sm:$0xf] }
 0xfb6   : > { %636 = vrot.lane.b32.xlu1 %v567_v38, %s1323_s11  ;;  %595 = vrot.lane.b32.xlu0 %v567_v38, %s1324_s17 }
 0xfba   : > { %656 = vrot.lane.b32.xlu1 %v571_v39, %s1319_s8  ;;  %551 = vrot.lane.b32.xlu0 %v549_v41, %s1321_s7 }
 0xfbe   : > { %677 = vrot.lane.b32.xlu1 %v567_v38, %s1325_s19  ;;  %593 = vrot.lane.b32.xlu0 %v549_v41, %s1324_s17 }
 0xfc2   : > { %613 = vrot.lane.b32.xlu1 %v567_v38, %s1322_s10  ;;  %634 = vrot.lane.b32.xlu0 %v549_v41, %s1323_s11 }
 0xfc6   : > { %576 = vrot.lane.b32.xlu1 %v568_v42, %s1301_s6  ;;  %617 = vrot.lane.b32.xlu0 %v609_v43, %s1322_s10  ;;  %s1335_s10 = smov 106  }
 0xfca   : > { %555 = vrot.lane.b32.xlu1 %v1197_v44, %s1321_s7  ;;  %658 = vrot.lane.b32.xlu0 %v650_v45, %s1319_s8  ;;  %s1334_s7 = smov 120  }
 0xfce   : > { %597 = vrot.lane.b32.xlu1 %v1198_v46, %s1324_s17  ;;  %638 = vrot.lane.b32.xlu0 %v1199_v47, %s1323_s11 }
 0xfd2   : > { %654 = vrot.lane.b32.xlu1 %v567_v38, %s1319_s8  ;;  %679 = vrot.lane.b32.xlu0 %v1200_v49, %s1325_s19  ;;  %s1333_s8 = smov 122  }
 0xfd6   : > { %697 = vrot.lane.b32.xlu1 %v571_v39, %s1328_s20  ;;  %675 = vrot.lane.b32.xlu0 %v549_v41, %s1325_s19  ;;  %s1337_s19 = smov 104  }
 0xfda   : > { %695 = vrot.lane.b32.xlu1 %v567_v38, %s1328_s20  ;;  %699 = vrot.lane.b32.xlu0 %v691_v50, %s1328_s20  ;;  %s1338_s20 = smov 116  }
 0xfde   : > { %729 = vperm.xlu0 %1194, %v726_v52  }
0x1020   : > { %v573_v53 = vpop.permute.xlu1 %572  ;;  %v554_v54 = vpop.permute.xlu0 %553 }
0x1024   : > { %v616_v55 = vpop.permute.xlu1 %615  ;;  %v575_v56 = vpop.permute.xlu0 %574 }
0x1025   : > { %v579_v57 = vsel %vm578_vm0, %v573_v53, %v575_v56 }
0x1026   : > { %584 = vst [vmem:[#allocation3 + $0x18] sm:$0xf] %v579_v57 }
0x1028   : > { %v637_v58 = vpop.permute.xlu1 %636  ;;  %v596_v59 = vpop.permute.xlu0 %595 }
0x102c   : > { %v657_v60 = vpop.permute.xlu1 %656  ;;  %v552_v61 = vpop.permute.xlu0 %551 }
0x102d   : > { %v558_v62 = vsel %vm557_vm1, %v552_v61, %v554_v54 }
0x102e   : > { %563 = vst [vmem:[#allocation3] sm:$0xf0] %v558_v62 }
0x1030   : > { %v678_v63 = vpop.permute.xlu1 %677  ;;  %v594_v1 = vpop.permute.xlu0 %593 }
0x1031   : > { %v600_v2 = vsel %vm599_vm2, %v594_v1, %v596_v59 }
0x1032   : > { %605 = vst [vmem:[#allocation3 + $0x18] sm:$0xf0] %v600_v2 }
0x1034   : > { %v614_v3 = vpop.permute.xlu1 %613  ;;  %v635_v4 = vpop.permute.xlu0 %634 }
0x1035   : > { %v620_v5 = vsel %vm619_vm3, %v614_v3, %v616_v55  ;;  %v641_v6 = vsel %vm640_vm4, %v635_v4, %v637_v58  ;;  %v711_v32 = vld [vmem:[#allocation3] sm:$0xff] }
0x1036   : > { %625 = vst [vmem:[#allocation3 + $0x30] sm:$0xf] %v620_v5  ;;  %646 = vst [vmem:[#allocation3 + $0x30] sm:$0xf0] %v641_v6 }
0x1038   : > { %v577_v7 = vpop.permute.xlu1 %576  ;;  %v618_v8 = vpop.permute.xlu0 %617 }
0x1039   : > { %v580_v9 = vsel %vm578_vm0, %v575_v56, %v577_v7  ;;  %586 = vst.msk [vmem:[#allocation3 + $0x28] sm:$0xf] %vm543_vm14, %v577_v7  ;;  %v621_v10 = vsel %vm619_vm3, %v616_v55, %v618_v8  ;;  %627 = vst.msk [vmem:[#allocation3 + $0x40] sm:$0xf] %vm543_vm14, %v618_v8  ;;  %v714_v0 = vld [vmem:[#allocation3 + $0x18] sm:$0xff]  ;;  %vm913_vm0 = vcmask 786048  }
0x103a   : > { %585 = vst [vmem:[#allocation3 + $0x20] sm:$0xf] %v580_v9  ;;  %626 = vst [vmem:[#allocation3 + $0x38] sm:$0xf] %v621_v10  ;;  %v1094_v33 = vpack.c.bf16 %v714_v0, %v711_v32  ;;  %vm928_vm3 = vcmask 1048448  }
0x103c   : > { %v556_v11 = vpop.permute.xlu1 %555  ;;  %v659_v12 = vpop.permute.xlu0 %658 }
0x103d   : > { %v559_v13 = vsel %vm557_vm1, %v554_v54, %v556_v11  ;;  %566 = vst.msk [vmem:[#allocation3 + $0x10] sm:$0xf0] %vm565_vm5, %v556_v11  ;;  %v662_v14 = vsel %vm660_vm6, %v657_v60, %v659_v12  ;;  %v717_v45 = vld [vmem:[#allocation3 + $0x30] sm:$0xff]  ;;  %vm918_vm1 = vcmask 917248  }
0x103e   : > { %668 = vst.msk [vmem:[#allocation3 + $0x58] sm:$0xf] %vm543_vm14, %v659_v12  ;;  %564 = vst [vmem:[#allocation3 + $0x8] sm:$0xf0] %v559_v13 }
0x103f   : > { %667 = vst [vmem:[#allocation3 + $0x50] sm:$0xf] %v662_v14 }
0x1040   : > { %v598_v15 = vpop.permute.xlu1 %597  ;;  %v639_v16 = vpop.permute.xlu0 %638 }
0x1041   : > { %v601_v17 = vsel %vm599_vm2, %v596_v59, %v598_v15  ;;  %607 = vst.msk [vmem:[#allocation3 + $0x28] sm:$0xf0] %vm565_vm5, %v598_v15  ;;  %v642_v18 = vsel %vm640_vm4, %v637_v58, %v639_v16  ;;  %648 = vst.msk [vmem:[#allocation3 + $0x40] sm:$0xf0] %vm565_vm5, %v639_v16  ;;  %vm959_vm2 = vcmask 818176   ;;  %vm925_vm4 = vcmask 932864  }
0x1042   : > { %606 = vst [vmem:[#allocation3 + $0x20] sm:$0xf0] %v601_v17  ;;  %647 = vst [vmem:[#allocation3 + $0x38] sm:$0xf0] %v642_v18 }
0x1044   : > { %v655_v19 = vpop.permute.xlu1 %654  ;;  %v680_v20 = vpop.permute.xlu0 %679  ;;  %v713_v25 = vld [vmem:[#allocation3 + $0x10] sm:$0xff] }
0x1045   : > { %v661_v21 = vsel %vm660_vm6, %v655_v19, %v657_v60  ;;  %v683_v22 = vsel %vm681_vm7, %v678_v63, %v680_v20  ;;  %689 = vst.msk [vmem:[#allocation3 + $0x58] sm:$0xf0] %vm565_vm5, %v680_v20  ;;  %v712_v29 = vld [vmem:[#allocation3 + $0x8] sm:$0xff] }
0x1046   : > { %666 = vst [vmem:[#allocation3 + $0x48] sm:$0xf] %v661_v21  ;;  %688 = vst [vmem:[#allocation3 + $0x50] sm:$0xf0] %v683_v22 }
0x1048   : > { %v698_v23 = vpop.permute.xlu1 %697  ;;  %v676_v24 = vpop.permute.xlu0 %675  ;;  %v716_v26 = vld [vmem:[#allocation3 + $0x28] sm:$0xff]  ;;  %v719_v37 = vld [vmem:[#allocation3 + $0x40] sm:$0xff] }
0x1049   : > { %v682_v27 = vsel %vm681_vm7, %v676_v24, %v678_v63  ;;  %v1101_v28 = vpack.c.bf16 %v716_v26, %v713_v25  ;;  %v715_v30 = vld [vmem:[#allocation3 + $0x20] sm:$0xff]  ;;  %v718_v42 = vld [vmem:[#allocation3 + $0x38] sm:$0xff] }
0x104a   : > { %687 = vst [vmem:[#allocation3 + $0x48] sm:$0xf0] %v682_v27  ;;  %v1092_v31 = vpack.c.bf16 %v715_v30, %v712_v29 }
0x104b   : > { %1102 = vmatpush3.bf16.msra.mxu1 %v1101_v28 }
0x104c   : > { %v696_v34 = vpop.permute.xlu1 %695  ;;  %v700_v36 = vpop.permute.xlu0 %699  ;;  %1093 = vmatprep.subr.bf16.mxu0 %v1092_v31  ;;  %1103 = vmatprep.subr.bf16.mxu1 %v1326_v48  ;;  %v722_v38 = vld [vmem:[#allocation3 + $0x58] sm:$0xff] }
0x104d   : > { %v702_v39 = vsel %vm701_vm8, %v696_v34, %v698_v23  ;;  %v703_v40 = vsel %vm701_vm8, %v698_v23, %v700_v36  ;;  %709 = vst.msk [vmem:[#allocation3 + $0x70] sm:$0xf] %vm543_vm14, %v700_v36  ;;  %1095 = vmatpush1.bf16.msra.mxu0 %v1094_v33  ;;  %v1104_v41 = vpack.c.bf16 %v722_v38, %v719_v37  ;;  %v721_v43 = vld [vmem:[#allocation3 + $0x50] sm:$0xff]  ;;  %vm903_vm14 = vcmask 523648  }
0x104e   : > { %707 = vst [vmem:[#allocation3 + $0x60] sm:$0xf] %v702_v39  ;;  %708 = vst [vmem:[#allocation3 + $0x68] sm:$0xf] %v703_v40  ;;  %v1096_v44 = vpack.c.bf16 %v721_v43, %v718_v42  ;;  %v710_v48 = vld [vmem:[%s1661_s1] sm:$0xff] }
0x104f   : > { %1105 = vmatpush3.bf16.msra.mxu1 %v1104_v41 }
0x1050   : > { %1097 = vmatprep.subr.bf16.mxu0 %v1096_v44  ;;  %1087 = vmatprep.subr.mxu1 %v1320_v35 }
0x1051   : > { %v720_v46 = vld [vmem:[#allocation3 + $0x48] sm:$0xff] }
0x1052   : > { %v1098_v47 = vpack.c.bf16 %v720_v46, %v717_v45 }
0x1054   : > { %1099 = vmatpush1.bf16.msra.mxu0 %v1098_v47  ;;  %v725_v49 = vld [vmem:[#allocation3 + $0x70] sm:$0xf] }
0x1055   : > { %1088 = vmatpush3.msk.msra.mxu1 %vm736_vm9, %v725_v49  ;;  %v724_v50 = vld [vmem:[#allocation3 + $0x68] sm:$0xf]  ;;  %v723_v51 = vld [vmem:[#allocation3 + $0x60] sm:$0xf] }
0x1056   : > { %1061 = vmatprep.subr.msk.mxu0 %vm736_vm9, %v724_v50  ;;  %1090 = vmatmul.mubr.msk.f32.vlgmr.msra.gmra.mrb[0].mxu1 %vm732_vm10, %v710_v48 }
0x1058   : > { %1062 = vmatpush1.msk.msra.mxu0 %vm736_vm9, %v723_v51 }
0x1059   : > { %1063 = vmatmul.mubr.msk.f32.vlgmr.msra.gmra.mrb[0].mxu0 %vm732_vm10, %v710_v48 }
0x105d   : > { %v730_v35 = vpop.permute.xlu0 %729 }
0x1129   : > { %v883_v52 = vpop.f32.mrb[0].mxu1 }
0x112a   : > { %v884_v53 = vadd.f32 %v883_v52, %v730_v35  ;;  %v1091_v54 = vpop.f32.mrb[1].mxu1 }
0x112c   : > { %957 = vrot.lane.b32.xlu0 %v884_v53, %s1330_s5  ;;  %v812_v55 = vpop.f32.mrb[0].mxu0 }
0x112d   : > { %v813_v56 = vadd.f32 %v812_v55, %v730_v35  ;;  %v814_v57 = vpop.f32.mrb[1].mxu0 }
0x112e   : > { %v815_v58 = vadd.f32 %v814_v57, %v730_v35 }
0x112f   : > { %890 = vrot.lane.b32.xlu1 %v813_v56, %s1301_s6  ;;  %888 = vst.msk [vmem:[%s1576_s9] sm:$0xff] %vm887_vm11, %v813_v56  ;;  %s1336_s6 = smov 118  }
0x1130   : > { %921 = vrot.lane.b32.xlu0 %v813_v56, %s1331_s4 }
0x1133   : > { %895 = vrot.lane.b32.xlu1 %v813_v56, %s1332_s23  ;;  %s1342_s23 = smov [#allocation7]  }
0x1134   : > { %934 = vrot.lane.b32.xlu0 %v815_v58, %s1324_s17  ;;  %s1341_s17 = smov 98  }
0x1137   : > { %900 = vrot.lane.b32.xlu1 %v813_v56, %s1333_s8  ;;  %s1235_s8 = sshll.u32 %s1342_s23, 4  ;;  %s1236_s8 = int_to_ptr.vmem [resolvable:$false] %s1235_s8 }
0x1138   : > { %938 = vrot.lane.b32.xlu0 %v815_v58, %s1323_s11  ;;  %s1072_s11 = sshll.u32 %s1384_s16, 8  ;;  %s968_s16 = scalar_lea.sflag [#allocation6], %s1468_s29 }
0x1139   : > { %p1238_p7 = scmp.lt.s32.totalorder %s1617_s27, %s1236_s8 }
0x113b   : > { %905 = vrot.lane.b32.xlu1 %v813_v56, %s1334_s7  ;;  %s1237_s7 = scalar_lea.vmem %s1236_s8, 512 }
0x113c   : > { %942 = vrot.lane.b32.xlu0 %v815_v58, %s1335_s10 }
0x113f   : > { %910 = vrot.lane.b32.xlu1 %v813_v56, %s1336_s6 }
0x1140   : > { %946 = vrot.lane.b32.xlu0 %v815_v58, %s1337_s19 }
0x1143   : > { %915 = vrot.lane.b32.xlu1 %v813_v56, %s1338_s20 }
0x1144   : > { %950 = vrot.lane.b32.xlu0 %v815_v58, %s1339_s22 }
0x1147   : > { %930 = vrot.lane.b32.xlu1 %v815_v58, %s1340_s26 }
0x1148   : > { %963 = vrot.lane.b32.xlu0 %v884_v53, %s1341_s17 }
0x114b   : > { %955 = vrot.lane.b32.xlu1 %v815_v58, %s1330_s5  ;;  %s1615_s5 = scalar_lea.hbm %s1663_s3, %s1072_s11 }
0x114f   : > { %923 = vrot.lane.b32.xlu1 %v815_v58, %s1331_s4  ;;  %s1231_s4 = scalar_lea.vmem %s1617_s27, 256 }
0x1150   : > { %p1232_p6 = scmp.ne.s32.totalorder %s1617_s27, %s1231_s4  ;;  %p1239_p10 = scmp.lt.s32.totalorder %s1237_s7, %s1231_s4 }
0x1152   : > { %p1233_p12 = pnand %p1232_p6, %p1672_p11  ;;  %p1240_p2 = por %p1239_p10, %p1238_p7 }
0x1154   : > { %p1234_p13 = pneg %p1233_p12 }
0x1156   : > { %p1241_p4 = pnand %p1240_p2, %p1234_p13 }
0x119e   : > { %v958_v59 = vpop.permute.xlu0 %957 }
0x11a1   : > { %v891_v60 = vpop.permute.xlu1 %890 }
0x11a2   : > { %894 = vst.msk [vmem:[%s1576_s9] sm:$0xff] %vm893_vm12, %v891_v60  ;;  %v922_v61 = vpop.permute.xlu0 %921 }
0x11a5   : > { %v896_v62 = vpop.permute.xlu1 %895 }
0x11a6   : > { %899 = vst.msk [vmem:[%s1576_s9] sm:$0xff] %vm898_vm13, %v896_v62  ;;  %v935_v63 = vpop.permute.xlu0 %934 }
0x11a9   : > { %v901_v1 = vpop.permute.xlu1 %900 }
0x11aa   : > { %904 = vst.msk [vmem:[%s1576_s9] sm:$0xff] %vm903_vm14, %v901_v1  ;;  %v939_v2 = vpop.permute.xlu0 %938 }
0x11ad   : > { %v906_v3 = vpop.permute.xlu1 %905 }
0x11ae   : > { %909 = vst.msk [vmem:[%s1576_s9] sm:$0xff] %vm908_vm15, %v906_v3  ;;  %v943_v4 = vpop.permute.xlu0 %942 }
0x11b1   : > { %v911_v5 = vpop.permute.xlu1 %910 }
0x11b2   : > { %914 = vst.msk [vmem:[%s1576_s9] sm:$0xff] %vm913_vm0, %v911_v5  ;;  %v947_v6 = vpop.permute.xlu0 %946 }
0x11b5   : > { %v916_v7 = vpop.permute.xlu1 %915 }
0x11b6   : > { %919 = vst.msk [vmem:[%s1576_s9] sm:$0xff] %vm918_vm1, %v916_v7  ;;  %v951_v9 = vpop.permute.xlu0 %950 }
0x11b9   : > { %v931_v8 = vpop.permute.xlu1 %930 }
0x11ba   : > { %933 = vst.msk [vmem:[%s1576_s9 + $0x8] sm:$0xff] %vm887_vm11, %v931_v8  ;;  %v964_v12 = vpop.permute.xlu0 %963 }
0x11bb   : > { %937 = vst.msk [vmem:[%s1576_s9 + $0x8] sm:$0xff] %vm893_vm12, %v935_v63 }
0x11bc   : > { %941 = vst.msk [vmem:[%s1576_s9 + $0x8] sm:$0xff] %vm898_vm13, %v939_v2 }
0x11bd   : > { %945 = vst.msk [vmem:[%s1576_s9 + $0x8] sm:$0xff] %vm903_vm14, %v943_v4  ;;  %v956_v10 = vpop.permute.xlu1 %955 }
0x11be   : > { %949 = vst.msk [vmem:[%s1576_s9 + $0x8] sm:$0xff] %vm908_vm15, %v947_v6  ;;  %v960_v11 = vsel %vm959_vm2, %v956_v10, %v958_v59 }
0x11bf   : > { %953 = vst.msk [vmem:[%s1576_s9 + $0x8] sm:$0xff] %vm913_vm0, %v951_v9 }
0x11c0   : > { %962 = vst.msk [vmem:[%s1576_s9 + $0x8] sm:$0xff] %vm918_vm1, %v960_v11 }
0x11c1   : > { %v924_v13 = vpop.permute.xlu1 %923  ;;  %966 = vst.msk [vmem:[%s1576_s9 + $0x8] sm:$0xff] %vm928_vm3, %v964_v12 }
0x11c2   : > { %v926_v14 = vsel %vm925_vm4, %v922_v61, %v924_v13 }
0x11c3   : > { %929 = vst.msk [vmem:[%s1576_s9] sm:$0xff] %vm928_vm3, %v926_v14 }
0x11c4   : > { %1244 = shalt.err (!%p1241_p4)
}
0x11c5   : > { %s1245_s29 = scalar_lea.hbm %s1615_s5, 256  ;;  %s1249_s6 = scalar_lea.hbm %s1663_s3, 512 }
0x11c6   : > { %p1246_p5 = scmp.ne.s32.totalorder %s1615_s5, %s1245_s29  ;;  %p1250_p0 = scmp.lt.u32.totalorder %s1615_s5, %s1663_s3 }
0x11c7   : > { %p1251_p1 = scmp.lt.u32.totalorder %s1249_s6, %s1245_s29  ;;  %p1253_p6 = scmp.lt.u32.totalorder %s1245_s29, %s1615_s5 }
0x11c8   : > { %p1247_p8 = pnand %p1246_p5, %p1672_p11 }
0x11c9   : > { %p1252_p3 = por %p1251_p1, %p1250_p0 }
0x11ca   : > { %p1248_p9 = pneg %p1247_p8 }
0x11cb   : > { %p1254_p12 = por %p1253_p6, %p1252_p3 }
0x11cd   : > { %p1255_p13 = pnand %p1254_p12, %p1248_p9 }
0x11cf   : > { %1258 = shalt.err (!%p1255_p13)
}
0x11d0   : > { %1108 = dma.vmem_to_hbm [thread:$0]  (%p1672_p11), %s1617_s27, 256, %s1615_s5, %s968_s16  }
0x11d1 PF: > { %s994_s22 = sand.u32 1, %s1285_s12   ;;  %p1673_p7 = scmp.ne.s32.totalorder %s1668_s25, 0 }
0x11d2   : > { %p1674_p10 = scmp.ge.s32.totalorder %s1297_s15, 2  ;;  %s995_s26 = scalar_lea.sflag [#allocation6], %s994_s22 }
0x11d4   : > { %p1115_p2 = pnand %p1674_p10, %p1673_p7 }
0x11d6   : > { %1280 = dma.done.wait (!%p1115_p2), %s995_s26, 256  }
0x11d7   : > { %1282 = vsyncadd (!%p1115_p2), %s995_s26, 4294967040  ;;  %p16_p4 = scmp.ge.s32.totalorder %s1388_s18, 4   ;;  %s1675_s12 = smov %s1289_s13 }
0x11d8   : > { %s1676_s13 = smov %s1293_s14  ;;  %s1677_s14 = smov %s1400_s21 }
0x11d9   : > { %s1678_s15 = smov %s1388_s18  ;;  %18 = sbr.rel (!%p16_p4) target bundleno = 5 (0x5), region = 77 }
0x11e0   :  { %1000 = vsyncpa [#allocation5], 1 }
0x11e1   :  { %1002 = vsyncpa [#allocation5 + $0x1], 1 }
0x11e2   :  { %1003 = vsyncpa [#allocation6], 1 }
0x11e3   :  { %1005 = vsyncpa [#allocation6 + $0x1], 1 }

</bundles_post_ra>
